<compile_context>
chip_gen: v5e
topology: v5e:2x2
jax: 0.10.0
libtpu: 0.0.40
codegen_flags: <defaults>
</compile_context>

<pallas_src>
import functools

import jax
import jax.numpy as jnp
from jax.experimental import pallas as pl
from jax.experimental.pallas import tpu as pltpu


# --------------------------------------------------------------------------
# Tiled linear:  y = x @ w + b
# --------------------------------------------------------------------------

def _linear_kernel(x_ref, w_ref, b_ref, o_ref, acc_ref):
    k = pl.program_id(2)

    @pl.when(k == 0)
    def _():
        acc_ref[...] = jnp.zeros_like(acc_ref)

    acc_ref[...] += jnp.dot(x_ref[...], w_ref[...],
                            preferred_element_type=jnp.float32)

    @pl.when(k == pl.num_programs(2) - 1)
    def _():
        o_ref[...] = (acc_ref[...] + b_ref[...].astype(jnp.float32)
                      ).astype(o_ref.dtype)


def _pick_block(dim, target, align):
    """Full dim if small, else the largest `align`-multiple <= target dividing dim."""
    if dim <= target:
        return dim
    b = (target // align) * align
    while b >= align:
        if dim % b == 0:
            return b
        b -= align
    return dim


def pallas_linear(x2d, w, b, *, bm_target=256, bn_target=512, bk_target=512):
    """y = x2d @ w + b  with x2d: (M, K), w: (K, N), b: (N,)."""
    M, K = x2d.shape
    N = w.shape[1]
    bm = _pick_block(M, bm_target, 8)
    bk = _pick_block(K, bk_target, 128)
    bn = _pick_block(N, bn_target, 128)
    b2d = b.reshape(1, N)
    return pl.pallas_call(
        _linear_kernel,
        out_shape=jax.ShapeDtypeStruct((M, N), x2d.dtype),
        grid=(M // bm, N // bn, K // bk),
        in_specs=[
            pl.BlockSpec((bm, bk), lambda i, j, k: (i, k)),
            pl.BlockSpec((bk, bn), lambda i, j, k: (k, j)),
            pl.BlockSpec((1, bn), lambda i, j, k: (0, j)),
        ],
        out_specs=pl.BlockSpec((bm, bn), lambda i, j, k: (i, j)),
        scratch_shapes=[pltpu.VMEM((bm, bn), jnp.float32)],
        compiler_params=pltpu.CompilerParams(
            dimension_semantics=("parallel", "parallel", "arbitrary")),
    )(x2d, w, b2d)


# --------------------------------------------------------------------------
# Fused relative attention (per batch element, head-blocked)
# --------------------------------------------------------------------------

def _rel_attn_kernel(q_ref, k_ref, v_ref, relt_ref, o_ref, p_ref, *,
                     max_relative_length, num_heads, scaling):
    L = max_relative_length
    hb = pl.program_id(1)

    q = q_ref[0].astype(jnp.float32) * scaling        # (Hb, T, D)
    k = k_ref[0].astype(jnp.float32)                  # (Hb, S, D)
    v = v_ref[0]                                      # (Hb, S, D)
    relt = relt_ref[...].astype(jnp.float32)          # (2L+1, D)

    Hb, T, D = q.shape
    S = k.shape[1]

    # content scores (MXU, batched over heads): (Hb, T, S)
    scores = jax.lax.dot_general(
        q, k, (((2,), (2,)), ((0,), (0,))),
        preferred_element_type=jnp.float32)

    # relative-position scores via the compact table (MXU): (Hb, T, 2L+1)
    r = jax.lax.dot_general(
        q, relt, (((2,), (1,)), ((), ())),
        preferred_element_type=jnp.float32)

    # expand r[h, t, clip(s - t, -L, L) + L] -> (Hb, T, S)
    row = jax.lax.broadcasted_iota(jnp.int32, (T, S), 0)   # t
    col = jax.lax.broadcasted_iota(jnp.int32, (T, S), 1)   # s
    bucket = jnp.clip(col - row, -L, L) + L                # (T, S) in [0, 2L]
    rel = jnp.zeros((Hb, T, S), jnp.float32)
    for m in range(2 * L + 1):
        rel = rel + jnp.where(bucket[None, :, :] == m,
                              r[:, :, m][:, :, None], 0.0)

    s = scores + rel

    # numerically-stable softmax over the source dimension (f32)
    s_max = jnp.max(s, axis=-1, keepdims=True)
    e = jnp.exp(s - s_max)
    denom = jnp.sum(e, axis=-1, keepdims=True)
    inv = pl.reciprocal(denom, approx=True)           # EUP slot
    inv = inv * (2.0 - denom * inv)                   # one Newton step -> f32 accuracy
    p = e * inv

    # weighted value sum (MXU, batched over heads): (Hb, T, D)
    attn = jax.lax.dot_general(
        p.astype(v.dtype), v, (((2,), (1,)), ((0,), (0,))),
        preferred_element_type=jnp.float32)

    o_ref[0] = attn.astype(o_ref.dtype)

    # fused head-average of the attention probabilities (accumulated across
    # head blocks; the p_ref block is resident across the hb axis).
    @pl.when(hb == 0)
    def _():
        p_ref[...] = jnp.zeros(p_ref.shape, p_ref.dtype)

    p_ref[0] += jnp.sum(p, axis=0)

    @pl.when(hb == pl.num_programs(1) - 1)
    def _():
        p_ref[0] = p_ref[0] * jnp.float32(1.0 / num_heads)


def _pick_head_block(num_heads, tgt_len, src_len, head_dim,
                     budget_bytes=8 << 20):
    """Largest divisor of num_heads whose per-step f32 intermediates fit budget."""
    per_head = 4 * (3 * tgt_len * src_len
                    + (tgt_len + 2 * src_len) * head_dim)
    hb = num_heads
    while hb > 1 and hb * per_head > budget_bytes:
        hb -= 1
        while num_heads % hb:
            hb -= 1
    return hb


def pallas_relative_attention(q, k, v, rel_table, *, max_relative_length,
                              scaling):
    """q,k,v: (B, H, T, D); rel_table: (2L+1, D).

    Returns:
      attn:  (B, H, T, D)
      avg_w: (B, T, S) head-averaged attention probabilities (f32)
    """
    B, H, T, D = q.shape
    S = k.shape[2]
    num_rel = rel_table.shape[0]
    head_block = _pick_head_block(H, T, S, D)
    n_hb = H // head_block

    kernel = functools.partial(
        _rel_attn_kernel,
        max_relative_length=max_relative_length,
        num_heads=H,
        scaling=scaling)

    return pl.pallas_call(
        kernel,
        out_shape=(
            jax.ShapeDtypeStruct((B, H, T, D), q.dtype),
            jax.ShapeDtypeStruct((B, T, S), jnp.float32),
        ),
        grid=(B, n_hb),
        in_specs=[
            pl.BlockSpec((1, head_block, T, D), lambda b, h: (b, h, 0, 0)),
            pl.BlockSpec((1, head_block, S, D), lambda b, h: (b, h, 0, 0)),
            pl.BlockSpec((1, head_block, S, D), lambda b, h: (b, h, 0, 0)),
            pl.BlockSpec((num_rel, D), lambda b, h: (0, 0)),
        ],
        out_specs=(
            pl.BlockSpec((1, head_block, T, D), lambda b, h: (b, h, 0, 0)),
            pl.BlockSpec((1, T, S), lambda b, h: (b, 0, 0)),
        ),
        compiler_params=pltpu.CompilerParams(
            dimension_semantics=("parallel", "arbitrary")),
    )(q, k, v, rel_table)


# --------------------------------------------------------------------------
# Module: parameters + forward
# --------------------------------------------------------------------------

def _xavier_uniform(key, shape, dtype=jnp.float32):
    fan_out, fan_in = shape  # torch Linear-style (out, in) convention
    bound = (6.0 / (fan_in + fan_out)) ** 0.5
    return jax.random.uniform(key, shape, dtype, minval=-bound, maxval=bound)


def init_params(key, embed_dim, qkv_dim, out_dim, max_relative_length):
    k1, k2, k3 = jax.random.split(key, 3)
    return {
        "in_proj_weight": _xavier_uniform(k1, (3 * qkv_dim, embed_dim)),  # (out, in)
        "in_proj_bias": jnp.zeros((3 * qkv_dim,), jnp.float32),
        "out_proj_weight": _xavier_uniform(k2, (out_dim, qkv_dim)),
        "out_proj_bias": jnp.zeros((out_dim,), jnp.float32),
        "relative_position_keys": _xavier_uniform(
            k3, (2 * max_relative_length + 1, embed_dim)),
    }


def relative_multihead_attention_forward(params, query, num_heads,
                                         max_relative_length):
    """Returns (attn (T, B, out_dim), avg_attn_weights (B, T, T)) — matches torch."""
    T, B, E = query.shape
    qkv_dim = params["in_proj_weight"].shape[0] // 3
    head_dim = qkv_dim // num_heads
    scaling = head_dim ** (-0.5)

    # ---- in-projection (tiled Pallas matmul) ----
    x2d = query.reshape(T * B, E)
    w_in = params["in_proj_weight"].T                       # (E, 3*qkv)
    qkv = pallas_linear(x2d, w_in, params["in_proj_bias"])  # (T*B, 3*qkv)
    qkv = qkv.reshape(T, B, 3 * qkv_dim)
    q, k, v = jnp.split(qkv, 3, axis=-1)                    # each (T, B, qkv)

    # (T, B, qkv) -> (B, H, T, head_dim); q scaling is folded into the kernel.
    def to_bhtd(x):
        return jnp.transpose(x.reshape(T, B, num_heads, head_dim), (1, 2, 0, 3))
    q4, k4, v4 = to_bhtd(q), to_bhtd(k), to_bhtd(v)

    # Compact relative-position table shared across heads (== table[idx][:,:,:D]).
    rel_table = params["relative_position_keys"][:, :head_dim]  # (2L+1, D)

    # ---- fused relative attention + in-kernel head-averaged probs ----
    attn, avg_w = pallas_relative_attention(
        q4, k4, v4, rel_table,
        max_relative_length=max_relative_length, scaling=scaling)
    # attn: (B, H, T, D), avg_w: (B, T, S)

    # ---- out-projection (tiled Pallas matmul) ----
    attn = jnp.transpose(attn, (2, 0, 1, 3)).reshape(T * B, qkv_dim)
    w_out = params["out_proj_weight"].T                     # (qkv, out_dim)
    out = pallas_linear(attn, w_out, params["out_proj_bias"])
    out = out.reshape(T, B, -1)

    return out, avg_w


# --------------------------------------------------------------------------
# Pure-JAX reference (self-check)
# --------------------------------------------------------------------------

def reference_forward(params, query, num_heads, max_relative_length):
    T, B, E = query.shape
    qkv_dim = params["in_proj_weight"].shape[0] // 3
    head_dim = qkv_dim // num_heads
    scaling = head_dim ** (-0.5)

    qkv = query @ params["in_proj_weight"].T + params["in_proj_bias"]
    q, k, v = jnp.split(qkv, 3, axis=-1)
    q = q * scaling
    to_heads = lambda x: jnp.transpose(
        x.reshape(T, B * num_heads, head_dim), (1, 0, 2))
    q, k, v = to_heads(q), to_heads(k), to_heads(v)

    rng = jnp.arange(T)
    idx = jnp.clip(rng[None, :] - rng[:, None],
                   -max_relative_length, max_relative_length) + max_relative_length
    relk = params["relative_position_keys"][idx][:, :, :head_dim]

    scores = jnp.einsum("btd,bsd->bts", q, k) + jnp.einsum("btd,tsd->bts", q, relk)
    p = jax.nn.softmax(scores, axis=-1)
    attn = jnp.einsum("bts,bsd->btd", p, v)
    attn = jnp.transpose(attn, (1, 0, 2)).reshape(T, B, qkv_dim)
    out = attn @ params["out_proj_weight"].T + params["out_proj_bias"]
    avg_w = p.reshape(B, num_heads, T, T).sum(axis=1) / num_heads
    return out, avg_w


# --------------------------------------------------------------------------

if __name__ == "__main__":
    # Small shapes consistent with the module's forward.
    tgt_len, bsz, embed_dim = 8, 2, 32
    num_heads = 4
    max_relative_length = 4
    qkv_dim = embed_dim
    out_dim = embed_dim

    key = jax.random.PRNGKey(0)
    kp, kq = jax.random.split(key)
    params = init_params(kp, embed_dim, qkv_dim, out_dim, max_relative_length)
    query = jax.random.normal(kq, (tgt_len, bsz, embed_dim), jnp.float32)

    fwd = jax.jit(functools.partial(relative_multihead_attention_forward,
                                    num_heads=num_heads,
                                    max_relative_length=max_relative_length))
    attn_out, attn_weights = fwd(params, query)
    jax.block_until_ready(attn_out)
    jax.block_until_ready(attn_weights)

    # correctness self-check against pure-JAX reference
    ref_out, ref_w = reference_forward(params, query, num_heads,
                                       max_relative_length)
    assert attn_out.shape == (tgt_len, bsz, out_dim)
    assert attn_weights.shape == (bsz, tgt_len, tgt_len)
    assert jnp.allclose(attn_out, ref_out, atol=1e-3, rtol=1e-3)
    assert jnp.allclose(attn_weights, ref_w, atol=1e-3, rtol=1e-3)

    print("KERNEL_OK")
</pallas_src>

<mosaic_0001>
module attributes {stable_mosaic.version = 11 : i64} {
  func.func @_linear_kernel(%arg0: i32, %arg1: i32, %arg2: i32, %arg3: memref<16x32xf32, #tpu.memory_space<vmem>>, %arg4: memref<32x96xf32, #tpu.memory_space<vmem>>, %arg5: memref<1x96xf32, #tpu.memory_space<vmem>>, %arg6: memref<16x96xf32, #tpu.memory_space<vmem>>, %arg7: memref<16x96xf32, #tpu.memory_space<vmem>>) attributes {dimension_semantics = [#tpu.dimension_semantics<parallel>, #tpu.dimension_semantics<parallel>, #tpu.dimension_semantics<arbitrary>], iteration_bounds = array<i64: 1, 1, 1>, scalar_prefetch = 0 : i64, scratch_operands = 1 : i64, tpu.core_type = #tpu.core_type<tc>, window_params = [{transform_indices = @transform_0, window_bounds = array<i64: 16, 32>}, {transform_indices = @transform_1, window_bounds = array<i64: 32, 96>}, {transform_indices = @transform_2, window_bounds = array<i64: 1, 96>}, {transform_indices = @transform_3, window_bounds = array<i64: 16, 96>}]} {
    %c0_i32 = arith.constant 0 : i32
    %0 = arith.cmpi eq, %arg2, %c0_i32 : i32
    %1 = arith.extui %0 : i1 to i32
    %c0_i32_0 = arith.constant 0 : i32
    %2 = arith.cmpi ne, %1, %c0_i32_0 : i32
    scf.if %2 {
      %cst_10 = arith.constant 0.000000e+00 : f32
      %12 = vector.broadcast %cst_10 : f32 to vector<16x96xf32>
      %c0_11 = arith.constant 0 : index
      %c0_12 = arith.constant 0 : index
      %13 = vector.load %arg7[%c0_11, %c0_12] : memref<16x96xf32, #tpu.memory_space<vmem>>, vector<16x96xf32>
      tpu.vector_store %arg7[%c0_11, %c0_12], %12 {strides = array<i32>} : memref<16x96xf32, #tpu.memory_space<vmem>>, vector<16x96xf32>,
    } else {
    }
    %c0 = arith.constant 0 : index
    %c0_1 = arith.constant 0 : index
    %3 = vector.load %arg7[%c0, %c0_1] : memref<16x96xf32, #tpu.memory_space<vmem>>, vector<16x96xf32>
    %c0_2 = arith.constant 0 : index
    %c0_3 = arith.constant 0 : index
    %4 = vector.load %arg3[%c0_2, %c0_3] : memref<16x32xf32, #tpu.memory_space<vmem>>, vector<16x32xf32>
    %c0_4 = arith.constant 0 : index
    %c0_5 = arith.constant 0 : index
    %5 = vector.load %arg4[%c0_4, %c0_5] : memref<32x96xf32, #tpu.memory_space<vmem>>, vector<32x96xf32>
    %cst = arith.constant dense<0.000000e+00> : vector<16x96xf32>
    %6 = tpu.matmul %4, %5, %cst {dimension_numbers = #tpu.dot_dimension_numbers<[1], [0], [0], [1], [0, 0, 1, 1], [], []>} : vector<16x32xf32>, vector<32x96xf32>, vector<16x96xf32> -> vector<16x96xf32>
    %7 = arith.addf %3, %6 : vector<16x96xf32>
    %c0_6 = arith.constant 0 : index
    %c0_7 = arith.constant 0 : index
    %8 = vector.load %arg7[%c0_6, %c0_7] : memref<16x96xf32, #tpu.memory_space<vmem>>, vector<16x96xf32>
    tpu.vector_store %arg7[%c0_6, %c0_7], %7 {strides = array<i32>} : memref<16x96xf32, #tpu.memory_space<vmem>>, vector<16x96xf32>,
    %c0_i32_8 = arith.constant 0 : i32
    %9 = arith.cmpi eq, %arg2, %c0_i32_8 : i32
    %10 = arith.extui %9 : i1 to i32
    %c0_i32_9 = arith.constant 0 : i32
    %11 = arith.cmpi ne, %10, %c0_i32_9 : i32
    scf.if %11 {
      %c0_10 = arith.constant 0 : index
      %c0_11 = arith.constant 0 : index
      %12 = vector.load %arg7[%c0_10, %c0_11] : memref<16x96xf32, #tpu.memory_space<vmem>>, vector<16x96xf32>
      %c0_12 = arith.constant 0 : index
      %c0_13 = arith.constant 0 : index
      %13 = vector.load %arg5[%c0_12, %c0_13] : memref<1x96xf32, #tpu.memory_space<vmem>>, vector<1x96xf32>
      %14 = vector.broadcast %13 : vector<1x96xf32> to vector<16x96xf32>
      %15 = arith.addf %12, %14 : vector<16x96xf32>
      %c0_14 = arith.constant 0 : index
      %c0_15 = arith.constant 0 : index
      %16 = vector.load %arg6[%c0_14, %c0_15] : memref<16x96xf32, #tpu.memory_space<vmem>>, vector<16x96xf32>
      tpu.vector_store %arg6[%c0_14, %c0_15], %15 {strides = array<i32>} : memref<16x96xf32, #tpu.memory_space<vmem>>, vector<16x96xf32>,
    } else {
    }
    return
  }
  func.func @transform_0(%arg0: i32, %arg1: i32, %arg2: i32) -> (i32, i32) {
    %c0_i32 = arith.constant 0 : i32
    return %arg0, %arg2 : i32, i32
  }
  func.func @transform_1(%arg0: i32, %arg1: i32, %arg2: i32) -> (i32, i32) {
    %c0_i32 = arith.constant 0 : i32
    return %arg2, %arg1 : i32, i32
  }
  func.func @transform_2(%arg0: i32, %arg1: i32, %arg2: i32) -> (i32, i32) {
    %c0_i32 = arith.constant 0 : i32
    %c0_i32_0 = arith.constant 0 : i32
    return %c0_i32, %arg1 : i32, i32
  }
  func.func @transform_3(%arg0: i32, %arg1: i32, %arg2: i32) -> (i32, i32) {
    %c0_i32 = arith.constant 0 : i32
    return %arg0, %arg1 : i32, i32
  }
}

module attributes {stable_mosaic.version = 11 : i64} {
  func.func @_linear_kernel(%arg0: i32, %arg1: i32, %arg2: i32, %arg3: memref<16x32xf32, #tpu.memory_space<vmem>>, %arg4: memref<32x32xf32, #tpu.memory_space<vmem>>, %arg5: memref<1x32xf32, #tpu.memory_space<vmem>>, %arg6: memref<16x32xf32, #tpu.memory_space<vmem>>, %arg7: memref<16x32xf32, #tpu.memory_space<vmem>>) attributes {dimension_semantics = [#tpu.dimension_semantics<parallel>, #tpu.dimension_semantics<parallel>, #tpu.dimension_semantics<arbitrary>], iteration_bounds = array<i64: 1, 1, 1>, scalar_prefetch = 0 : i64, scratch_operands = 1 : i64, tpu.core_type = #tpu.core_type<tc>, window_params = [{transform_indices = @transform_0, window_bounds = array<i64: 16, 32>}, {transform_indices = @transform_1, window_bounds = array<i64: 32, 32>}, {transform_indices = @transform_2, window_bounds = array<i64: 1, 32>}, {transform_indices = @transform_3, window_bounds = array<i64: 16, 32>}]} {
    %c0_i32 = arith.constant 0 : i32
    %0 = arith.cmpi eq, %arg2, %c0_i32 : i32
    %1 = arith.extui %0 : i1 to i32
    %c0_i32_0 = arith.constant 0 : i32
    %2 = arith.cmpi ne, %1, %c0_i32_0 : i32
    scf.if %2 {
      %cst_10 = arith.constant 0.000000e+00 : f32
      %12 = vector.broadcast %cst_10 : f32 to vector<16x32xf32>
      %c0_11 = arith.constant 0 : index
      %c0_12 = arith.constant 0 : index
      %13 = vector.load %arg7[%c0_11, %c0_12] : memref<16x32xf32, #tpu.memory_space<vmem>>, vector<16x32xf32>
      tpu.vector_store %arg7[%c0_11, %c0_12], %12 {strides = array<i32>} : memref<16x32xf32, #tpu.memory_space<vmem>>, vector<16x32xf32>,
    } else {
    }
    %c0 = arith.constant 0 : index
    %c0_1 = arith.constant 0 : index
    %3 = vector.load %arg7[%c0, %c0_1] : memref<16x32xf32, #tpu.memory_space<vmem>>, vector<16x32xf32>
    %c0_2 = arith.constant 0 : index
    %c0_3 = arith.constant 0 : index
    %4 = vector.load %arg3[%c0_2, %c0_3] : memref<16x32xf32, #tpu.memory_space<vmem>>, vector<16x32xf32>
    %c0_4 = arith.constant 0 : index
    %c0_5 = arith.constant 0 : index
    %5 = vector.load %arg4[%c0_4, %c0_5] : memref<32x32xf32, #tpu.memory_space<vmem>>, vector<32x32xf32>
    %cst = arith.constant dense<0.000000e+00> : vector<16x32xf32>
    %6 = tpu.matmul %4, %5, %cst {dimension_numbers = #tpu.dot_dimension_numbers<[1], [0], [0], [1], [0, 0, 1, 1], [], []>} : vector<16x32xf32>, vector<32x32xf32>, vector<16x32xf32> -> vector<16x32xf32>
    %7 = arith.addf %3, %6 : vector<16x32xf32>
    %c0_6 = arith.constant 0 : index
    %c0_7 = arith.constant 0 : index
    %8 = vector.load %arg7[%c0_6, %c0_7] : memref<16x32xf32, #tpu.memory_space<vmem>>, vector<16x32xf32>
    tpu.vector_store %arg7[%c0_6, %c0_7], %7 {strides = array<i32>} : memref<16x32xf32, #tpu.memory_space<vmem>>, vector<16x32xf32>,
    %c0_i32_8 = arith.constant 0 : i32
    %9 = arith.cmpi eq, %arg2, %c0_i32_8 : i32
    %10 = arith.extui %9 : i1 to i32
    %c0_i32_9 = arith.constant 0 : i32
    %11 = arith.cmpi ne, %10, %c0_i32_9 : i32
    scf.if %11 {
      %c0_10 = arith.constant 0 : index
      %c0_11 = arith.constant 0 : index
      %12 = vector.load %arg7[%c0_10, %c0_11] : memref<16x32xf32, #tpu.memory_space<vmem>>, vector<16x32xf32>
      %c0_12 = arith.constant 0 : index
      %c0_13 = arith.constant 0 : index
      %13 = vector.load %arg5[%c0_12, %c0_13] : memref<1x32xf32, #tpu.memory_space<vmem>>, vector<1x32xf32>
      %14 = vector.broadcast %13 : vector<1x32xf32> to vector<16x32xf32>
      %15 = arith.addf %12, %14 : vector<16x32xf32>
      %c0_14 = arith.constant 0 : index
      %c0_15 = arith.constant 0 : index
      %16 = vector.load %arg6[%c0_14, %c0_15] : memref<16x32xf32, #tpu.memory_space<vmem>>, vector<16x32xf32>
      tpu.vector_store %arg6[%c0_14, %c0_15], %15 {strides = array<i32>} : memref<16x32xf32, #tpu.memory_space<vmem>>, vector<16x32xf32>,
    } else {
    }
    return
  }
  func.func @transform_0(%arg0: i32, %arg1: i32, %arg2: i32) -> (i32, i32) {
    %c0_i32 = arith.constant 0 : i32
    return %arg0, %arg2 : i32, i32
  }
  func.func @transform_1(%arg0: i32, %arg1: i32, %arg2: i32) -> (i32, i32) {
    %c0_i32 = arith.constant 0 : i32
    return %arg2, %arg1 : i32, i32
  }
  func.func @transform_2(%arg0: i32, %arg1: i32, %arg2: i32) -> (i32, i32) {
    %c0_i32 = arith.constant 0 : i32
    %c0_i32_0 = arith.constant 0 : i32
    return %c0_i32, %arg1 : i32, i32
  }
  func.func @transform_3(%arg0: i32, %arg1: i32, %arg2: i32) -> (i32, i32) {
    %c0_i32 = arith.constant 0 : i32
    return %arg0, %arg1 : i32, i32
  }
}

module attributes {stable_mosaic.version = 11 : i64} {
  func.func @_rel_attn_kernel(%arg0: i32, %arg1: i32, %arg2: memref<1x4x8x8xf32, #tpu.memory_space<vmem>>, %arg3: memref<1x4x8x8xf32, #tpu.memory_space<vmem>>, %arg4: memref<1x4x8x8xf32, #tpu.memory_space<vmem>>, %arg5: memref<9x8xf32, #tpu.memory_space<vmem>>, %arg6: memref<1x4x8x8xf32, #tpu.memory_space<vmem>>, %arg7: memref<1x8x8xf32, #tpu.memory_space<vmem>>) attributes {dimension_semantics = [#tpu.dimension_semantics<parallel>, #tpu.dimension_semantics<arbitrary>], iteration_bounds = array<i64: 2, 1>, scalar_prefetch = 0 : i64, scratch_operands = 0 : i64, tpu.core_type = #tpu.core_type<tc>, window_params = [{transform_indices = @transform_0, window_bounds = array<i64: 1, 4, 8, 8>}, {transform_indices = @transform_1, window_bounds = array<i64: 1, 4, 8, 8>}, {transform_indices = @transform_2, window_bounds = array<i64: 1, 4, 8, 8>}, {pipeline_mode = #tpu.pipeline_mode<synchronous>, transform_indices = @transform_3, window_bounds = array<i64: 9, 8>}, {transform_indices = @transform_4, window_bounds = array<i64: 1, 4, 8, 8>}, {transform_indices = @transform_5, window_bounds = array<i64: 1, 8, 8>}]} {
    %c0 = arith.constant 0 : index
    %c0_0 = arith.constant 0 : index
    %c0_1 = arith.constant 0 : index
    %c0_2 = arith.constant 0 : index
    %0 = vector.load %arg2[%c0, %c0_0, %c0_1, %c0_2] : memref<1x4x8x8xf32, #tpu.memory_space<vmem>>, vector<1x4x8x8xf32>
    %1 = vector.shape_cast %0 : vector<1x4x8x8xf32> to vector<4x8x8xf32>
    %cst = arith.constant 0.353553385 : f32
    %2 = vector.broadcast %cst : f32 to vector<4x8x8xf32>
    %3 = arith.mulf %1, %2 : vector<4x8x8xf32>
    %c0_3 = arith.constant 0 : index
    %c0_4 = arith.constant 0 : index
    %c0_5 = arith.constant 0 : index
    %c0_6 = arith.constant 0 : index
    %4 = vector.load %arg3[%c0_3, %c0_4, %c0_5, %c0_6] : memref<1x4x8x8xf32, #tpu.memory_space<vmem>>, vector<1x4x8x8xf32>
    %5 = vector.shape_cast %4 : vector<1x4x8x8xf32> to vector<4x8x8xf32>
    %c0_7 = arith.constant 0 : index
    %c0_8 = arith.constant 0 : index
    %c0_9 = arith.constant 0 : index
    %c0_10 = arith.constant 0 : index
    %6 = vector.load %arg4[%c0_7, %c0_8, %c0_9, %c0_10] : memref<1x4x8x8xf32, #tpu.memory_space<vmem>>, vector<1x4x8x8xf32>
    %7 = vector.shape_cast %6 : vector<1x4x8x8xf32> to vector<4x8x8xf32>
    %c0_11 = arith.constant 0 : index
    %c0_12 = arith.constant 0 : index
    %8 = vector.load %arg5[%c0_11, %c0_12] : memref<9x8xf32, #tpu.memory_space<vmem>>, vector<9x8xf32>
    %cst_13 = arith.constant dense<0.000000e+00> : vector<4x8x8xf32>
    %9 = tpu.matmul %3, %5, %cst_13 {dimension_numbers = #tpu.dot_dimension_numbers<[2], [2], [1], [1], [0, 0, 0, 1, 1, 1], [0], [0]>} : vector<4x8x8xf32>, vector<4x8x8xf32>, vector<4x8x8xf32> -> vector<4x8x8xf32>
    %cst_14 = arith.constant dense<0.000000e+00> : vector<4x8x9xf32>
    %10 = tpu.matmul %3, %8, %cst_14 {dimension_numbers = #tpu.dot_dimension_numbers<[2], [1], [0, 1], [0], [0, 0, 0, 1, 1, 0], [], []>} : vector<4x8x8xf32>, vector<9x8xf32>, vector<4x8x9xf32> -> vector<4x8x9xf32>
    %11 = tpu.iota {dimensions = array<i32: 0>} : vector<8x8xi32>
    %12 = tpu.iota {dimensions = array<i32: 1>} : vector<8x8xi32>
    %13 = arith.subi %12, %11 : vector<8x8xi32>
    %c-4_i32 = arith.constant -4 : i32
    %c4_i32 = arith.constant 4 : i32
    %14 = vector.broadcast %c-4_i32 : i32 to vector<8x8xi32>
    %15 = arith.maxsi %14, %13 : vector<8x8xi32>
    %16 = vector.broadcast %c4_i32 : i32 to vector<8x8xi32>
    %17 = arith.minsi %16, %15 : vector<8x8xi32>
    %c4_i32_15 = arith.constant 4 : i32
    %18 = vector.broadcast %c4_i32_15 : i32 to vector<8x8xi32>
    %19 = arith.addi %17, %18 : vector<8x8xi32>
    %cst_16 = arith.constant 0.000000e+00 : f32
    %20 = vector.broadcast %cst_16 : f32 to vector<4x8x8xf32>
    %21 = vector.shape_cast %19 : vector<8x8xi32> to vector<1x8x8xi32>
    %c0_i32 = arith.constant 0 : i32
    %22 = vector.broadcast %c0_i32 : i32 to vector<1x8x8xi32>
    %23 = arith.cmpi eq, %21, %22 : vector<1x8x8xi32>
    %24 = vector.extract_strided_slice %10 {offsets = [0, 0, 0], sizes = [4, 8, 1], strides = [1, 1, 1]} : vector<4x8x9xf32> to vector<4x8x1xf32>
    %25 = vector.shape_cast %24 : vector<4x8x1xf32> to vector<4x8xf32>
    %26 = vector.shape_cast %25 : vector<4x8xf32> to vector<4x8x1xf32>
    %cst_17 = arith.constant 0.000000e+00 : f32
    %27 = vector.shape_cast %23 : vector<1x8x8xi1> to vector<1x8x8xi1>
    %28 = vector.broadcast %27 : vector<1x8x8xi1> to vector<4x8x8xi1>
    %29 = vector.shape_cast %26 : vector<4x8x1xf32> to vector<4x8x1xf32>
    %30 = vector.broadcast %29 : vector<4x8x1xf32> to vector<4x8x8xf32>
    %31 = vector.broadcast %cst_17 : f32 to vector<4x8x8xf32>
    %32 = arith.select %28, %30, %31 : vector<4x8x8xi1>, vector<4x8x8xf32>
    %33 = arith.addf %20, %32 : vector<4x8x8xf32>
    %34 = vector.shape_cast %19 : vector<8x8xi32> to vector<1x8x8xi32>
    %c1_i32 = arith.constant 1 : i32
    %35 = vector.broadcast %c1_i32 : i32 to vector<1x8x8xi32>
    %36 = arith.cmpi eq, %34, %35 : vector<1x8x8xi32>
    %37 = vector.extract_strided_slice %10 {offsets = [0, 0, 1], sizes = [4, 8, 1], strides = [1, 1, 1]} : vector<4x8x9xf32> to vector<4x8x1xf32>
    %38 = vector.shape_cast %37 : vector<4x8x1xf32> to vector<4x8xf32>
    %39 = vector.shape_cast %38 : vector<4x8xf32> to vector<4x8x1xf32>
    %cst_18 = arith.constant 0.000000e+00 : f32
    %40 = vector.shape_cast %36 : vector<1x8x8xi1> to vector<1x8x8xi1>
    %41 = vector.broadcast %40 : vector<1x8x8xi1> to vector<4x8x8xi1>
    %42 = vector.shape_cast %39 : vector<4x8x1xf32> to vector<4x8x1xf32>
    %43 = vector.broadcast %42 : vector<4x8x1xf32> to vector<4x8x8xf32>
    %44 = vector.broadcast %cst_18 : f32 to vector<4x8x8xf32>
    %45 = arith.select %41, %43, %44 : vector<4x8x8xi1>, vector<4x8x8xf32>
    %46 = arith.addf %33, %45 : vector<4x8x8xf32>
    %47 = vector.shape_cast %19 : vector<8x8xi32> to vector<1x8x8xi32>
    %c2_i32 = arith.constant 2 : i32
    %48 = vector.broadcast %c2_i32 : i32 to vector<1x8x8xi32>
    %49 = arith.cmpi eq, %47, %48 : vector<1x8x8xi32>
    %50 = vector.extract_strided_slice %10 {offsets = [0, 0, 2], sizes = [4, 8, 1], strides = [1, 1, 1]} : vector<4x8x9xf32> to vector<4x8x1xf32>
    %51 = vector.shape_cast %50 : vector<4x8x1xf32> to vector<4x8xf32>
    %52 = vector.shape_cast %51 : vector<4x8xf32> to vector<4x8x1xf32>
    %cst_19 = arith.constant 0.000000e+00 : f32
    %53 = vector.shape_cast %49 : vector<1x8x8xi1> to vector<1x8x8xi1>
    %54 = vector.broadcast %53 : vector<1x8x8xi1> to vector<4x8x8xi1>
    %55 = vector.shape_cast %52 : vector<4x8x1xf32> to vector<4x8x1xf32>
    %56 = vector.broadcast %55 : vector<4x8x1xf32> to vector<4x8x8xf32>
    %57 = vector.broadcast %cst_19 : f32 to vector<4x8x8xf32>
    %58 = arith.select %54, %56, %57 : vector<4x8x8xi1>, vector<4x8x8xf32>
    %59 = arith.addf %46, %58 : vector<4x8x8xf32>
    %60 = vector.shape_cast %19 : vector<8x8xi32> to vector<1x8x8xi32>
    %c3_i32 = arith.constant 3 : i32
    %61 = vector.broadcast %c3_i32 : i32 to vector<1x8x8xi32>
    %62 = arith.cmpi eq, %60, %61 : vector<1x8x8xi32>
    %63 = vector.extract_strided_slice %10 {offsets = [0, 0, 3], sizes = [4, 8, 1], strides = [1, 1, 1]} : vector<4x8x9xf32> to vector<4x8x1xf32>
    %64 = vector.shape_cast %63 : vector<4x8x1xf32> to vector<4x8xf32>
    %65 = vector.shape_cast %64 : vector<4x8xf32> to vector<4x8x1xf32>
    %cst_20 = arith.constant 0.000000e+00 : f32
    %66 = vector.shape_cast %62 : vector<1x8x8xi1> to vector<1x8x8xi1>
    %67 = vector.broadcast %66 : vector<1x8x8xi1> to vector<4x8x8xi1>
    %68 = vector.shape_cast %65 : vector<4x8x1xf32> to vector<4x8x1xf32>
    %69 = vector.broadcast %68 : vector<4x8x1xf32> to vector<4x8x8xf32>
    %70 = vector.broadcast %cst_20 : f32 to vector<4x8x8xf32>
    %71 = arith.select %67, %69, %70 : vector<4x8x8xi1>, vector<4x8x8xf32>
    %72 = arith.addf %59, %71 : vector<4x8x8xf32>
    %73 = vector.shape_cast %19 : vector<8x8xi32> to vector<1x8x8xi32>
    %c4_i32_21 = arith.constant 4 : i32
    %74 = vector.broadcast %c4_i32_21 : i32 to vector<1x8x8xi32>
    %75 = arith.cmpi eq, %73, %74 : vector<1x8x8xi32>
    %76 = vector.extract_strided_slice %10 {offsets = [0, 0, 4], sizes = [4, 8, 1], strides = [1, 1, 1]} : vector<4x8x9xf32> to vector<4x8x1xf32>
    %77 = vector.shape_cast %76 : vector<4x8x1xf32> to vector<4x8xf32>
    %78 = vector.shape_cast %77 : vector<4x8xf32> to vector<4x8x1xf32>
    %cst_22 = arith.constant 0.000000e+00 : f32
    %79 = vector.shape_cast %75 : vector<1x8x8xi1> to vector<1x8x8xi1>
    %80 = vector.broadcast %79 : vector<1x8x8xi1> to vector<4x8x8xi1>
    %81 = vector.shape_cast %78 : vector<4x8x1xf32> to vector<4x8x1xf32>
    %82 = vector.broadcast %81 : vector<4x8x1xf32> to vector<4x8x8xf32>
    %83 = vector.broadcast %cst_22 : f32 to vector<4x8x8xf32>
    %84 = arith.select %80, %82, %83 : vector<4x8x8xi1>, vector<4x8x8xf32>
    %85 = arith.addf %72, %84 : vector<4x8x8xf32>
    %86 = vector.shape_cast %19 : vector<8x8xi32> to vector<1x8x8xi32>
    %c5_i32 = arith.constant 5 : i32
    %87 = vector.broadcast %c5_i32 : i32 to vector<1x8x8xi32>
    %88 = arith.cmpi eq, %86, %87 : vector<1x8x8xi32>
    %89 = vector.extract_strided_slice %10 {offsets = [0, 0, 5], sizes = [4, 8, 1], strides = [1, 1, 1]} : vector<4x8x9xf32> to vector<4x8x1xf32>
    %90 = vector.shape_cast %89 : vector<4x8x1xf32> to vector<4x8xf32>
    %91 = vector.shape_cast %90 : vector<4x8xf32> to vector<4x8x1xf32>
    %cst_23 = arith.constant 0.000000e+00 : f32
    %92 = vector.shape_cast %88 : vector<1x8x8xi1> to vector<1x8x8xi1>
    %93 = vector.broadcast %92 : vector<1x8x8xi1> to vector<4x8x8xi1>
    %94 = vector.shape_cast %91 : vector<4x8x1xf32> to vector<4x8x1xf32>
    %95 = vector.broadcast %94 : vector<4x8x1xf32> to vector<4x8x8xf32>
    %96 = vector.broadcast %cst_23 : f32 to vector<4x8x8xf32>
    %97 = arith.select %93, %95, %96 : vector<4x8x8xi1>, vector<4x8x8xf32>
    %98 = arith.addf %85, %97 : vector<4x8x8xf32>
    %99 = vector.shape_cast %19 : vector<8x8xi32> to vector<1x8x8xi32>
    %c6_i32 = arith.constant 6 : i32
    %100 = vector.broadcast %c6_i32 : i32 to vector<1x8x8xi32>
    %101 = arith.cmpi eq, %99, %100 : vector<1x8x8xi32>
    %102 = vector.extract_strided_slice %10 {offsets = [0, 0, 6], sizes = [4, 8, 1], strides = [1, 1, 1]} : vector<4x8x9xf32> to vector<4x8x1xf32>
    %103 = vector.shape_cast %102 : vector<4x8x1xf32> to vector<4x8xf32>
    %104 = vector.shape_cast %103 : vector<4x8xf32> to vector<4x8x1xf32>
    %cst_24 = arith.constant 0.000000e+00 : f32
    %105 = vector.shape_cast %101 : vector<1x8x8xi1> to vector<1x8x8xi1>
    %106 = vector.broadcast %105 : vector<1x8x8xi1> to vector<4x8x8xi1>
    %107 = vector.shape_cast %104 : vector<4x8x1xf32> to vector<4x8x1xf32>
    %108 = vector.broadcast %107 : vector<4x8x1xf32> to vector<4x8x8xf32>
    %109 = vector.broadcast %cst_24 : f32 to vector<4x8x8xf32>
    %110 = arith.select %106, %108, %109 : vector<4x8x8xi1>, vector<4x8x8xf32>
    %111 = arith.addf %98, %110 : vector<4x8x8xf32>
    %112 = vector.shape_cast %19 : vector<8x8xi32> to vector<1x8x8xi32>
    %c7_i32 = arith.constant 7 : i32
    %113 = vector.broadcast %c7_i32 : i32 to vector<1x8x8xi32>
    %114 = arith.cmpi eq, %112, %113 : vector<1x8x8xi32>
    %115 = vector.extract_strided_slice %10 {offsets = [0, 0, 7], sizes = [4, 8, 1], strides = [1, 1, 1]} : vector<4x8x9xf32> to vector<4x8x1xf32>
    %116 = vector.shape_cast %115 : vector<4x8x1xf32> to vector<4x8xf32>
    %117 = vector.shape_cast %116 : vector<4x8xf32> to vector<4x8x1xf32>
    %cst_25 = arith.constant 0.000000e+00 : f32
    %118 = vector.shape_cast %114 : vector<1x8x8xi1> to vector<1x8x8xi1>
    %119 = vector.broadcast %118 : vector<1x8x8xi1> to vector<4x8x8xi1>
    %120 = vector.shape_cast %117 : vector<4x8x1xf32> to vector<4x8x1xf32>
    %121 = vector.broadcast %120 : vector<4x8x1xf32> to vector<4x8x8xf32>
    %122 = vector.broadcast %cst_25 : f32 to vector<4x8x8xf32>
    %123 = arith.select %119, %121, %122 : vector<4x8x8xi1>, vector<4x8x8xf32>
    %124 = arith.addf %111, %123 : vector<4x8x8xf32>
    %125 = vector.shape_cast %19 : vector<8x8xi32> to vector<1x8x8xi32>
    %c8_i32 = arith.constant 8 : i32
    %126 = vector.broadcast %c8_i32 : i32 to vector<1x8x8xi32>
    %127 = arith.cmpi eq, %125, %126 : vector<1x8x8xi32>
    %128 = vector.extract_strided_slice %10 {offsets = [0, 0, 8], sizes = [4, 8, 1], strides = [1, 1, 1]} : vector<4x8x9xf32> to vector<4x8x1xf32>
    %129 = vector.shape_cast %128 : vector<4x8x1xf32> to vector<4x8xf32>
    %130 = vector.shape_cast %129 : vector<4x8xf32> to vector<4x8x1xf32>
    %cst_26 = arith.constant 0.000000e+00 : f32
    %131 = vector.shape_cast %127 : vector<1x8x8xi1> to vector<1x8x8xi1>
    %132 = vector.broadcast %131 : vector<1x8x8xi1> to vector<4x8x8xi1>
    %133 = vector.shape_cast %130 : vector<4x8x1xf32> to vector<4x8x1xf32>
    %134 = vector.broadcast %133 : vector<4x8x1xf32> to vector<4x8x8xf32>
    %135 = vector.broadcast %cst_26 : f32 to vector<4x8x8xf32>
    %136 = arith.select %132, %134, %135 : vector<4x8x8xi1>, vector<4x8x8xf32>
    %137 = arith.addf %124, %136 : vector<4x8x8xf32>
    %138 = arith.addf %9, %137 : vector<4x8x8xf32>
    %cst_27 = arith.constant dense<0xFF800000> : vector<4x8xf32>
    %139 = vector.multi_reduction <maximumf>, %138, %cst_27 [2] : vector<4x8x8xf32> to vector<4x8xf32>
    %140 = vector.shape_cast %139 : vector<4x8xf32> to vector<4x8x1xf32>
    %141 = vector.broadcast %140 : vector<4x8x1xf32> to vector<4x8x8xf32>
    %142 = arith.subf %138, %141 : vector<4x8x8xf32>
    %143 = math.exp %142 : vector<4x8x8xf32>
    %cst_28 = arith.constant dense<0.000000e+00> : vector<4x8xf32>
    %144 = vector.multi_reduction <add>, %143, %cst_28 [2] : vector<4x8x8xf32> to vector<4x8xf32>
    %145 = vector.shape_cast %144 : vector<4x8xf32> to vector<4x8x1xf32>
    %146 = tpu.reciprocal %145 {approx = true} : vector<4x8x1xf32> -> vector<4x8x1xf32>
    %147 = arith.mulf %145, %146 : vector<4x8x1xf32>
    %cst_29 = arith.constant 2.000000e+00 : f32
    %148 = vector.broadcast %cst_29 : f32 to vector<4x8x1xf32>
    %149 = arith.subf %148, %147 : vector<4x8x1xf32>
    %150 = arith.mulf %146, %149 : vector<4x8x1xf32>
    %151 = vector.broadcast %150 : vector<4x8x1xf32> to vector<4x8x8xf32>
    %152 = arith.mulf %143, %151 : vector<4x8x8xf32>
    %cst_30 = arith.constant dense<0.000000e+00> : vector<4x8x8xf32>
    %153 = tpu.matmul %152, %7, %cst_30 {dimension_numbers = #tpu.dot_dimension_numbers<[2], [1], [1], [2], [0, 0, 0, 1, 1, 2], [0], [0]>} : vector<4x8x8xf32>, vector<4x8x8xf32>, vector<4x8x8xf32> -> vector<4x8x8xf32>
    %c0_31 = arith.constant 0 : index
    %c0_32 = arith.constant 0 : index
    %c0_33 = arith.constant 0 : index
    %c0_34 = arith.constant 0 : index
    %154 = vector.load %arg6[%c0_31, %c0_32, %c0_33, %c0_34] : memref<1x4x8x8xf32, #tpu.memory_space<vmem>>, vector<1x4x8x8xf32>
    %155 = vector.shape_cast %154 : vector<1x4x8x8xf32> to vector<4x8x8xf32>
    %156 = vector.shape_cast %153 : vector<4x8x8xf32> to vector<1x4x8x8xf32>
    tpu.vector_store %arg6[%c0_31, %c0_32, %c0_33, %c0_34], %156 {strides = array<i32>} : memref<1x4x8x8xf32, #tpu.memory_space<vmem>>, vector<1x4x8x8xf32>,
    %c0_i32_35 = arith.constant 0 : i32
    %157 = arith.cmpi eq, %arg1, %c0_i32_35 : i32
    %158 = arith.extui %157 : i1 to i32
    %c0_i32_36 = arith.constant 0 : i32
    %159 = arith.cmpi ne, %158, %c0_i32_36 : i32
    scf.if %159 {
      %cst_46 = arith.constant 0.000000e+00 : f32
      %170 = vector.broadcast %cst_46 : f32 to vector<1x8x8xf32>
      %c0_47 = arith.constant 0 : index
      %c0_48 = arith.constant 0 : index
      %c0_49 = arith.constant 0 : index
      %171 = vector.load %arg7[%c0_47, %c0_48, %c0_49] : memref<1x8x8xf32, #tpu.memory_space<vmem>>, vector<1x8x8xf32>
      tpu.vector_store %arg7[%c0_47, %c0_48, %c0_49], %170 {strides = array<i32>} : memref<1x8x8xf32, #tpu.memory_space<vmem>>, vector<1x8x8xf32>,
    } else {
    }
    %c0_37 = arith.constant 0 : index
    %c0_38 = arith.constant 0 : index
    %c0_39 = arith.constant 0 : index
    %160 = vector.load %arg7[%c0_37, %c0_38, %c0_39] : memref<1x8x8xf32, #tpu.memory_space<vmem>>, vector<1x8x8xf32>
    %161 = vector.shape_cast %160 : vector<1x8x8xf32> to vector<8x8xf32>
    %cst_40 = arith.constant dense<0.000000e+00> : vector<8x8xf32>
    %162 = vector.multi_reduction <add>, %152, %cst_40 [0] : vector<4x8x8xf32> to vector<8x8xf32>
    %163 = arith.addf %161, %162 : vector<8x8xf32>
    %c0_41 = arith.constant 0 : index
    %c0_42 = arith.constant 0 : index
    %c0_43 = arith.constant 0 : index
    %164 = vector.load %arg7[%c0_41, %c0_42, %c0_43] : memref<1x8x8xf32, #tpu.memory_space<vmem>>, vector<1x8x8xf32>
    %165 = vector.shape_cast %164 : vector<1x8x8xf32> to vector<8x8xf32>
    %166 = vector.shape_cast %163 : vector<8x8xf32> to vector<1x8x8xf32>
    tpu.vector_store %arg7[%c0_41, %c0_42, %c0_43], %166 {strides = array<i32>} : memref<1x8x8xf32, #tpu.memory_space<vmem>>, vector<1x8x8xf32>,
    %c0_i32_44 = arith.constant 0 : i32
    %167 = arith.cmpi eq, %arg1, %c0_i32_44 : i32
    %168 = arith.extui %167 : i1 to i32
    %c0_i32_45 = arith.constant 0 : i32
    %169 = arith.cmpi ne, %168, %c0_i32_45 : i32
    scf.if %169 {
      %c0_46 = arith.constant 0 : index
      %c0_47 = arith.constant 0 : index
      %c0_48 = arith.constant 0 : index
      %170 = vector.load %arg7[%c0_46, %c0_47, %c0_48] : memref<1x8x8xf32, #tpu.memory_space<vmem>>, vector<1x8x8xf32>
      %171 = vector.shape_cast %170 : vector<1x8x8xf32> to vector<8x8xf32>
      %cst_49 = arith.constant 2.500000e-01 : f32
      %172 = vector.broadcast %cst_49 : f32 to vector<8x8xf32>
      %173 = arith.mulf %171, %172 : vector<8x8xf32>
      %c0_50 = arith.constant 0 : index
      %c0_51 = arith.constant 0 : index
      %c0_52 = arith.constant 0 : index
      %174 = vector.load %arg7[%c0_50, %c0_51, %c0_52] : memref<1x8x8xf32, #tpu.memory_space<vmem>>, vector<1x8x8xf32>
      %175 = vector.shape_cast %174 : vector<1x8x8xf32> to vector<8x8xf32>
      %176 = vector.shape_cast %173 : vector<8x8xf32> to vector<1x8x8xf32>
      tpu.vector_store %arg7[%c0_50, %c0_51, %c0_52], %176 {strides = array<i32>} : memref<1x8x8xf32, #tpu.memory_space<vmem>>, vector<1x8x8xf32>,
    } else {
    }
    return
  }
  func.func @transform_0(%arg0: i32, %arg1: i32) -> (i32, i32, i32, i32) {
    %c0_i32 = arith.constant 0 : i32
    %c0_i32_0 = arith.constant 0 : i32
    %c0_i32_1 = arith.constant 0 : i32
    return %arg0, %arg1, %c0_i32, %c0_i32_0 : i32, i32, i32, i32
  }
  func.func @transform_1(%arg0: i32, %arg1: i32) -> (i32, i32, i32, i32) {
    %c0_i32 = arith.constant 0 : i32
    %c0_i32_0 = arith.constant 0 : i32
    %c0_i32_1 = arith.constant 0 : i32
    return %arg0, %arg1, %c0_i32, %c0_i32_0 : i32, i32, i32, i32
  }
  func.func @transform_2(%arg0: i32, %arg1: i32) -> (i32, i32, i32, i32) {
    %c0_i32 = arith.constant 0 : i32
    %c0_i32_0 = arith.constant 0 : i32
    %c0_i32_1 = arith.constant 0 : i32
    return %arg0, %arg1, %c0_i32, %c0_i32_0 : i32, i32, i32, i32
  }
  func.func @transform_3(%arg0: i32, %arg1: i32) -> (i32, i32) {
    %c0_i32 = arith.constant 0 : i32
    %c0_i32_0 = arith.constant 0 : i32
    %c0_i32_1 = arith.constant 0 : i32
    return %c0_i32, %c0_i32_0 : i32, i32
  }
  func.func @transform_4(%arg0: i32, %arg1: i32) -> (i32, i32, i32, i32) {
    %c0_i32 = arith.constant 0 : i32
    %c0_i32_0 = arith.constant 0 : i32
    %c0_i32_1 = arith.constant 0 : i32
    return %arg0, %arg1, %c0_i32, %c0_i32_0 : i32, i32, i32, i32
  }
  func.func @transform_5(%arg0: i32, %arg1: i32) -> (i32, i32, i32) {
    %c0_i32 = arith.constant 0 : i32
    %c0_i32_0 = arith.constant 0 : i32
    %c0_i32_1 = arith.constant 0 : i32
    return %arg0, %c0_i32, %c0_i32_0 : i32, i32, i32
  }
}

</mosaic_0001>

<bundles_post_ra>
// kernel: relative_multihead_attention_forward.5
= control target key start
LH: loop header
LB: loop body
LE: loop exit
PB: predicated region body
PF: predicated region fallthrough
CT: control target
= control target key end

     0   :  { %vm19_vm0 = vcmask 261120   ;;  %v132_v2 = vmov 0.0   ;;  %s188_s0 = inlined_call_operand.vmem [shape: f32[16,32], index: 0, kind: input, shape index: {}]   ;;  %s189_s1 = inlined_call_operand.vmem [shape: f32[32,32], index: 1, kind: input, shape index: {}]   ;;  %s190_s2 = inlined_call_operand.vmem [shape: f32[1,32], index: 2, kind: input, shape index: {}]   ;;  %s191_s3 = inlined_call_operand.hbm [shape: f32[16,32], index: 3, kind: output, shape index: {}]  }
   0x1   :  { %v29_v0 = vld [vmem:[%s189_s1 + $0x18] sm:$0xff]  ;;  %v28_v1 = vld [vmem:[%s189_s1 + $0x10] sm:$0xff]  ;;  %20 = vst.msk [vmem:[#allocation2] sm:$0xff] %vm19_vm0, %v132_v2  ;;  %v27_v3 = vld [vmem:[%s189_s1 + $0x8] sm:$0xff] }
   0x2   :  { %49 = vmatpush.msra.mxu0 %v29_v0  ;;  %97 = vmatpush.msra.mxu1 %v29_v0  ;;  %21 = vst.msk [vmem:[#allocation2 + $0x8] sm:$0xff] %vm19_vm0, %v132_v2 }
   0x3   :  { %8 = vsyncpa [#allocation4], 0  ;;  %v26_v4 = vld [vmem:[%s189_s1] sm:$0xff]  ;;  %v25_v6 = vld [vmem:[%s188_s0 + $0x8] sm:$0xff]  ;;  %s83_s28 = sshll.u32 %s191_s3, 4  ;;  %s134_s29 = smov 128   ;;  %s84_s28 = int_to_ptr.hbm [resolvable:$true] %s83_s28 }
   0x4   :  { %50 = vmatpush.msra.mxu0 %v28_v1  ;;  %98 = vmatpush.msra.mxu1 %v28_v1  ;;  %v24_v5 = vld [vmem:[%s188_s0] sm:$0xff]  ;;  %s133_s0 = smov [#allocation3]   ;;  %s135_s30 = smov 8  }
   0x5   :  { %v105_v13 = vld [vmem:[%s190_s2] ss:$0 sm:$0xff]  ;;  %s81_s25 = sshll.u32 %s133_s0, 4  ;;  %s82_s25 = int_to_ptr.vmem [resolvable:$true] %s81_s25 }
   0x6   :  { %51 = vmatpush.msra.mxu0 %v27_v3  ;;  %99 = vmatpush.msra.mxu1 %v27_v3 }
   0x8   :  { %52 = vmatpush.msra.mxu0 %v26_v4  ;;  %100 = vmatpush.msra.mxu1 %v26_v4  ;;  %v22_v7 = vld [vmem:[#allocation2] sm:$0xff] }
   0x9   :  { %95 = vmatmul.msk.f32.vlgmr.msra.gmra.mxu0 %vm19_vm0, %v24_v5  ;;  %96 = vmatmul.msk.f32.vlgmr.msra.gmra.mxu1 %vm19_vm0, %v25_v6  ;;  %v23_v8 = vld [vmem:[#allocation2 + $0x8] sm:$0xff] }
  0x86   :  { %v54_v9 = vpop.f32.mrf.mxu0  ;;  %v57_v10 = vpop.f32.mrf.mxu1 }
  0x87   :  { %v60_v11 = vadd.f32 %v54_v9, %v22_v7  ;;  %v61_v12 = vadd.f32 %v57_v10, %v23_v8 }
  0x89   :  { %62 = vst.msk [vmem:[#allocation2] sm:$0xff] %vm19_vm0, %v60_v11 }
  0x8a   :  { %63 = vst.msk [vmem:[#allocation2 + $0x8] sm:$0xff] %vm19_vm0, %v61_v12 }
  0x90   :  { %v67_v14 = vld [vmem:[#allocation2] sm:$0xff] }
  0x91   :  { %v68_v15 = vld [vmem:[#allocation2 + $0x8] sm:$0xff]  ;;  %v73_v16 = vadd.f32 %v105_v13, %v67_v14 }
  0x92   :  { %v74_v17 = vadd.f32 %v105_v13, %v68_v15 }
  0x93   :  { %75 = vst.msk [vmem:[#allocation3] sm:$0xff] %vm19_vm0, %v73_v16 }
  0x94   :  { %76 = vst.msk [vmem:[#allocation3 + $0x8] sm:$0xff] %vm19_vm0, %v74_v17 }
  0x95   :  { %89 = dma.vmem_to_hbm [thread:$0]  %s82_s25, 256, %s84_s28, [#allocation4], %s134_s29, %s134_s29, %s135_s30  }
  0x96   :  { %130 = dma.done.wait [#allocation4], 256  }
  0x97   :  { %131 = vsyncadd [#allocation4], 4294967040 }
  0x98   :  { %94 = vsyncpa [#allocation4], 1 }

// kernel: relative_multihead_attention_forward.3
= control target key start
LH: loop header
LB: loop body
LE: loop exit
PB: predicated region body
PF: predicated region fallthrough
CT: control target
= control target key end

     0   :  { %8 = vsyncpa [#allocation4], 0  ;;  %s225_s0 = inlined_call_operand.hbm [shape: f32[16,32], index: 0, kind: input, shape index: {}]   ;;  %s226_s1 = inlined_call_operand.hbm [shape: f32[32,96], index: 1, kind: input, shape index: {}]   ;;  %s227_s2 = inlined_call_operand.vmem [shape: f32[1,96], index: 2, kind: input, shape index: {}]   ;;  %s228_s3 = inlined_call_operand.vmem [shape: f32[16,96], index: 3, kind: output, shape index: {}]  }
   0x1   :  { %s14_s14 = sshll.u32 %s225_s0, 4  ;;  %s15_s14 = int_to_ptr.hbm [resolvable:$true] %s14_s14 }
   0x2   :  { %9 = vsyncpa [#allocation6], 0  ;;  %s179_s15 = smov [#allocation3]   ;;  %s27_s19 = sshll.u32 %s226_s1, 4  ;;  %s28_s19 = int_to_ptr.hbm [resolvable:$true] %s27_s19 }
   0x3   :  { %s16_s16 = sshll.u32 %s179_s15, 4  ;;  %s180_s20 = smov 128   ;;  %s17_s16 = int_to_ptr.vmem [resolvable:$true] %s16_s16 }
   0x4   :  { %s181_s21 = smov 8   ;;  %s182_s22 = smov [#allocation5]  }
   0x5   :  { %22 = dma.hbm_to_vmem [thread:$0]  %s15_s14, 256, %s17_s16, [#allocation4], %s180_s20, %s180_s20, %s181_s21  }
   0x6   :  { %s29_s23 = sshll.u32 %s182_s22, 4  ;;  %s30_s23 = int_to_ptr.vmem [resolvable:$true] %s29_s23 }
   0x7   :  { %35 = dma.hbm_to_vmem [thread:$0]  %s28_s19, 512, %s30_s23, [#allocation6], %s180_s20, %s180_s20, %s181_s21  }
   0x8   :  { %175 = dma.done.wait [#allocation4], 256  }
   0x9   :  { %176 = vsyncadd [#allocation4], 4294967040 }
   0xa   :  { %177 = dma.done.wait [#allocation6], 512  }
   0xb   :  { %178 = vsyncadd [#allocation6], 4294966784  ;;  %vm50_vm0 = vcmask 785408   ;;  %v183_v0 = vmov 0.0   ;;  %v60_v1 = vld [vmem:[#allocation5 + $0x18] sm:$0xff]  ;;  %v59_v2 = vld [vmem:[#allocation5 + $0x10] sm:$0xff] }
   0xc   :  { %51 = vst.msk [vmem:[#allocation2] sm:$0xff] %vm50_vm0, %v183_v0  ;;  %80 = vmatpush.msra.mxu0 %v60_v1  ;;  %117 = vmatpush.msra.mxu1 %v60_v1  ;;  %v58_v3 = vld [vmem:[#allocation5 + $0x8] sm:$0xff]  ;;  %v57_v4 = vld [vmem:[#allocation5] sm:$0xff]  ;;  %v55_v5 = vld [vmem:[#allocation3] sm:$0xff]  ;;  %vm61_vm1 = vcmask 261120  }
   0xd   :  { %52 = vst.msk [vmem:[#allocation2 + $0x8] sm:$0xff] %vm50_vm0, %v183_v0  ;;  %v56_v6 = vld [vmem:[#allocation3 + $0x8] sm:$0xff]  ;;  %v126_v13 = vld [vmem:[%s227_s2] ss:$0 sm:$0xff] }
   0xe   :  { %81 = vmatpush.msra.mxu0 %v59_v2  ;;  %118 = vmatpush.msra.mxu1 %v59_v2 }
  0x10   :  { %82 = vmatpush.msra.mxu0 %v58_v3  ;;  %119 = vmatpush.msra.mxu1 %v58_v3 }
  0x12   :  { %83 = vmatpush.msra.mxu0 %v57_v4  ;;  %120 = vmatpush.msra.mxu1 %v57_v4 }
  0x13   :  { %115 = vmatmul.msk.f32.vlgmr.msra.gmra.mxu0 %vm61_vm1, %v55_v5  ;;  %116 = vmatmul.msk.f32.vlgmr.msra.gmra.mxu1 %vm61_vm1, %v56_v6  ;;  %v53_v7 = vld [vmem:[#allocation2] sm:$0xff] }
  0x14   :  { %v54_v8 = vld [vmem:[#allocation2 + $0x8] sm:$0xff] }
  0x90   :  { %v85_v9 = vpop.f32.mrf.mxu0  ;;  %v88_v10 = vpop.f32.mrf.mxu1 }
  0x91   :  { %v91_v11 = vadd.f32 %v85_v9, %v53_v7  ;;  %v92_v12 = vadd.f32 %v88_v10, %v54_v8 }
  0x93   :  { %94 = vst.msk [vmem:[#allocation2] sm:$0xff] %vm50_vm0, %v91_v11 }
  0x94   :  { %95 = vst.msk [vmem:[#allocation2 + $0x8] sm:$0xff] %vm50_vm0, %v92_v12 }
  0x9a   :  { %v99_v14 = vld [vmem:[#allocation2] sm:$0xff] }
  0x9b   :  { %v105_v15 = vadd.f32 %v126_v13, %v99_v14  ;;  %v100_v16 = vld [vmem:[#allocation2 + $0x8] sm:$0xff] }
  0x9c   :  { %v106_v17 = vadd.f32 %v126_v13, %v100_v16 }
  0x9d   :  { %107 = vst.msk [vmem:[%s228_s3] sm:$0xff] %vm50_vm0, %v105_v15 }
  0x9e   :  { %108 = vst.msk [vmem:[%s228_s3 + $0x8] sm:$0xff] %vm50_vm0, %v106_v17 }
  0x9f   :  { %113 = vsyncpa [#allocation4], 1 }
  0xa0   :  { %114 = vsyncpa [#allocation6], 1 }

// kernel: relative_multihead_attention_forward.4
= control target key start
LH: loop header
LB: loop body
LE: loop exit
PB: predicated region body
PF: predicated region fallthrough
CT: control target
= control target key end

     0   :  { %11 = vsyncpa [#allocation3], 0  ;;  %s1691_s0 = inlined_call_operand.vmem [shape: f32[2,4,8,8], index: 0, kind: input, shape index: {}]   ;;  %s1692_s1 = inlined_call_operand.vmem [shape: f32[2,4,8,8], index: 1, kind: input, shape index: {}]   ;;  %s1693_s2 = inlined_call_operand.vmem [shape: f32[2,4,8,8], index: 2, kind: input, shape index: {}]   ;;  %s1694_s3 = inlined_call_operand.vmem [shape: f32[9,8], index: 3, kind: input, shape index: {}]   ;;  %s1695_s4 = inlined_call_operand.vmem [shape: f32[2,4,8,8], index: 4, kind: output, shape index: {0}]   ;;  %s1696_s5 = inlined_call_operand.hbm [shape: f32[2,8,8], index: 5, kind: output, shape index: {1}]  }
   0x1   :  { %13 = vsyncpa [#allocation3 + $0x1], 0  ;;  %s1388_s18 = smov 0   ;;  %s1390_s19 = smov 0  }
   0x2   :  { %s1392_s20 = smov 0   ;;  %s1394_s21 = smov 0  }
   0x3   :  { %s1396_s22 = smov 0   ;;  %s1398_s23 = smov 0  }
   0x4 LB: > { %s1110_s24 = sadd.s32 4294967295, %s1346_s23   ;;  %s1111_s25 = sadd.s32 4294967294, %s1346_s23   ;;  %s1346_s23 = sphi %s1398_s23, %s19_s23   ;;  %s1342_s22 = sphi %s1396_s22, %s1703_s22   ;;  %s1338_s21 = sphi %s1394_s21, %s1702_s21   ;;  %s1334_s20 = sphi %s1392_s20, %s1701_s20   ;;  %s1330_s19 = sphi %s1390_s19, %s1700_s19   ;;  %s1326_s18 = sphi %s1388_s18, %s1699_s18  }
   0x5   : > { %s31_s26 = sadd.s32 1, %s1342_s22  ;;  %s171_s27 = sadd.s32 1, %s1334_s20 }
   0x6   : > { %p33_p0 = scmp.ge.s32.totalorder %s31_s26, 2  ;;  %p181_p1 = scmp.ne.s32.totalorder %s1334_s20, %s1330_s19 }
   0x7   : > { %p182_p2 = scmp.eq.s32.totalorder %s1110_s24, 1  ;;  %p187_p3 = scmp.ne.s32.totalorder %s1330_s19, %s1326_s18 }
   0x8   : > { %s1705_s26 = smov (%p33_p0, %s31_s26), 0  ;;  %p188_p5 = scmp.eq.s32.totalorder %s1111_s25, 1 }
   0x9   : > { %p1428_p4 = por %p182_p2, %p181_p1  ;;  %s168_s29 = ssub.s32 %s1342_s22, %s1705_s26 }
   0xa   : > { %p1114_p6 = scmp.ge.s32.totalorder %s1346_s23, 1  ;;  %p169_p7 = scmp.eq.s32.totalorder %s168_s29, 0 }
   0xb   : > { %p1435_p8 = por %p188_p5, %p187_p3  ;;  %p248_p9 = scmp.lt.s32.totalorder %s1346_s23, 3 }
   0xc   : > { %s1441_s6 = scalar_select %p169_p7, %s1334_s20, %s171_s27  }
   0xd   : > { %p249_p10 = pnand %p1114_p6, %p248_p9 }
   0xe   : > { %p308_p11 = scmp.lt.s32.totalorder (!%p249_p10), %s1338_s21, 1  ;;  %s304_s7 = sand.u32 (!%p249_p10), 1, %s1330_s19  }
   0xf   : > { %252 = sbr.rel (%p249_p10) target bundleno = 783 (0x30f), region = 36  ;;  %s1115_s8 = sshll.u32 (!%p249_p10), %s304_s7, 3 }
  0x10   : > { %s1627_s9 = scalar_lea.vmem (!%p249_p10), [#allocation2], %s1115_s8  ;;  %s1143_s10 = sshll.u32 (!%p249_p10), %s1338_s21, 3 }
  0x11   : > { %s959_s14 = scalar_lea.hbm (!%p249_p10), %s1696_s5, %s1143_s10  ;;  %s945_s17 = scalar_lea.sflag (!%p249_p10), [#allocation3], %s304_s7 }
  0x12   : > { %s963_s16 = sshll.u32 (!%p249_p10), %s959_s14, 4  ;;  %s964_s16 = int_to_ptr.hbm [resolvable:$true] %s963_s16 }
  0x14   : > { %v364_v0 = vld [vmem:[%s1694_s3 + $0x8] sm:$0x1]  ;;  %vm365_vm0 = vcmask 64512   ;;  %v363_v1 = vld [vmem:[%s1694_s3] sm:$0xff]  ;;  %s309_s11 = scalar_select %p308_p11, %s1338_s21, 1  ;;  %v1348_v2 = vmov 4   ;;  %v413_v28 = vlaneseq }
  0x15   : > { %1124 = vmatpush.xpose.msk.msra.mxu0 %vm365_vm0, %v364_v0  ;;  %1150 = vmatpush.xpose.msk.msra.mxu3 %vm365_vm0, %v364_v0  ;;  %v1349_v3 = vmov 2   ;;  %v1350_v4 = vmov 0   ;;  %v1351_v15 = vmov 7   ;;  %v1352_v16 = vmov 3  }
  0x16   : > { %1221 = vset.pattern.permute.xlu2 %v1348_v2  ;;  %1219 = vset.pattern.permute.xlu1 %v1349_v3  ;;  %s1455_s12 = sshll.u32 %s309_s11, 5  ;;  %v1353_v17 = vmov 1   ;;  %v1354_v19 = vmov 8   ;;  %v1355_v20 = vmov 5   ;;  %v1356_v22 = vmov 6  }
  0x17   : > { %1217 = vset.pattern.permute.xlu0 %v1350_v4  ;;  %s315_s15 = scalar_lea.vmem %s1691_s0, %s1455_s12  ;;  %s1474_s24 = scalar_lea.vmem %s1692_s1, %s1455_s12  ;;  %v414_v29 = vshrl.u32 %v413_v28, 7  ;;  %v416_v30 = vand.u32 127, %v413_v28 }
  0x18   : > { %v347_v5 = vld [vmem:[%s315_s15] sm:$0xff]  ;;  %v350_v6 = vld [vmem:[%s315_s15 + $0x18] sm:$0xff]  ;;  %v348_v9 = vld [vmem:[%s315_s15 + $0x8] sm:$0xff]  ;;  %s1617_s29 = scalar_lea.vmem %s1693_s2, %s1455_s12 }
  0x19   : > { %1125 = vmatpush.xpose.msk.msra.mxu0 %vm365_vm0, %v363_v1  ;;  %1151 = vmatpush.xpose.msk.msra.mxu3 %vm365_vm0, %v363_v1  ;;  %v351_v7 = vmul.f32 0.35355338, %v347_v5  ;;  %v354_v8 = vmul.f32 0.35355338, %v350_v6  ;;  %v352_v10 = vmul.f32 0.35355338, %v348_v9  ;;  %v417_v32 = vsub.s32 %v416_v30, %v414_v29 }
  0x1a   : > { %v349_v11 = vld [vmem:[%s315_s15 + $0x10] sm:$0xff]  ;;  %v355_v13 = vld [vmem:[%s1474_s24] sm:$0xff]  ;;  %v356_v21 = vld [vmem:[%s1474_s24 + $0x8] sm:$0xff]  ;;  %s961_s15 = sshll.u32 %s1627_s9, 4  ;;  %s962_s15 = int_to_ptr.vmem [resolvable:$true] %s961_s15 }
  0x1b   : > { %v1466_v12 = vmul.f32 0.35355338, %v349_v11  ;;  %1130 = vmatpush.xpose.msk.msra.mxu1 %vm365_vm0, %v355_v13  ;;  %1132 = vmatpush.xpose.msk.msra.mxu2 %vm365_vm0, %v356_v21  ;;  %v358_v25 = vld [vmem:[%s1474_s24 + $0x18] sm:$0xff]  ;;  %v357_v26 = vld [vmem:[%s1474_s24 + $0x10] sm:$0xff]  ;;  %vm418_vm1 = vcmp.gt.s32.totalorder %v417_v32, 4294967292  ;;  %s1282_s24 = sshra.s32 %s964_s16, 4  ;;  %s1283_s24 = int_to_ptr.hbm [resolvable:$true] %s1282_s24 }
  0x1c   : > { %1126 = vmatmul.msk.f32.vlgmr.msra.gmra.mxu0 %vm365_vm0, %v351_v7  ;;  %1129 = vmatmul.msk.f32.vlgmr.msra.gmra.mxu3 %vm365_vm0, %v354_v8  ;;  %v419_v33 = vsel %vm418_vm1, %v417_v32, 4294967292  ;;  %s1284_s25 = scalar_lea.hbm %s1283_s24, 8  ;;  %p1289_p1 = scmp.lt.s32.totalorder %s1283_s24, %s1696_s5 }
  0x1d   : > { %1134 = vmatpush.xpose.msk.msrb.mxu3 %vm365_vm0, %v357_v26  ;;  %vm420_vm2 = vcmp.lt.s32.totalorder %v419_v33, 4  ;;  %p1285_p12 = scmp.ne.s32.totalorder %s1283_s24, %s1284_s25 }
  0x1e   : > { %1131 = vmatmul.msk.f32.vlgmr.msra.gmra.mxu1 %vm365_vm0, %v351_v7  ;;  %1133 = vmatmul.msk.f32.vlgmr.msra.gmra.mxu2 %vm365_vm0, %v352_v10  ;;  %v421_v37 = vsel %vm420_vm2, %v419_v33, 4 }
  0x1f   : > { %1136 = vmatpush.xpose.msk.msrb.mxu1 %vm365_vm0, %v358_v25  ;;  %v1514_v38 = vadd.s32 4, %v421_v37  ;;  %p1286_p13 = pnand %p1285_p12, %p1428_p4 }
  0x21   : > { %vm454_vm3 = vcmp.eq.s32.totalorder %v1514_v38, 1  ;;  %vm423_vm4 = vcmp.eq.s32.totalorder %v1514_v38, 0  ;;  %vm481_vm5 = vcmp.eq.s32.totalorder %v1514_v38, 2  ;;  %vm508_vm6 = vcmp.eq.s32.totalorder %v1514_v38, 3  ;;  %p1287_p0 = pneg %p1286_p13 }
  0x22   : > { %vm535_vm7 = vcmp.eq.s32.totalorder %v1514_v38, 4  ;;  %vm562_vm8 = vcmp.eq.s32.totalorder %v1514_v38, 5  ;;  %vm589_vm9 = vcmp.eq.s32.totalorder %v1514_v38, 6  ;;  %vm616_vm10 = vcmp.eq.s32.totalorder %v1514_v38, 7 }
  0x23   : > { %vm643_vm11 = vcmp.eq.s32.totalorder %v1514_v38, 8 }
  0x24   : > { %1127 = vmatmul.msk.f32.gmra.mxu0 %vm365_vm0, %v352_v10  ;;  %1135 = vmatmul.msk.f32.vlgmr.msrb.gmra.mxu3 %vm365_vm0, %v1466_v12 }
  0x26   : > { %1137 = vmatmul.msk.f32.vlgmr.msrb.gmra.mxu1 %vm365_vm0, %v354_v8 }
  0x2c   : > { %1128 = vmatmul.msk.f32.gmra.mxu0 %vm365_vm0, %v1466_v12 }
  0x99   : > { %v401_v14 = vpop.f32.mrf.mxu0 }
  0x9a   : > { %539 = vperm.xlu2 %1221, %v401_v14   ;;  %485 = vperm.xlu1 %1219, %v401_v14  }
  0x9b   : > { %428 = vperm.xlu0 %1217, %v401_v14   ;;  %v690_v63 = vpop.f32.mrf.mxu1 }
  0x9f   : > { %v410_v18 = vpop.f32.mrf.mxu3 }
  0xa1   : > { %v404_v23 = vpop.f32.mrf.mxu0 }
  0xa2   : > { %1224 = vset.pattern.permute.xlu2 %v1351_v15  ;;  %1220 = vset.pattern.permute.xlu1 %v1352_v16 }
  0xa3   : > { %1218 = vset.pattern.permute.xlu0 %v1353_v17  ;;  %620 = vperm.xlu2 %1224, %v401_v14  }
  0xa4   : > { %512 = vperm.xlu1 %1220, %v401_v14   ;;  %458 = vperm.xlu0 %1218, %v401_v14  }
  0xa9   : > { %v407_v24 = vpop.f32.mrf.mxu0 }
  0xab   : > { %1225 = vset.pattern.permute.xlu2 %v1354_v19 }
  0xac   : > { %1222 = vset.pattern.permute.xlu1 %v1355_v20  ;;  %470 = vperm.xlu0 %1218, %v410_v18  }
  0xad   : > { %647 = vperm.xlu2 %1225, %v401_v14   ;;  %566 = vperm.xlu1 %1222, %v401_v14  }
  0xb4   : > { %1227 = vset.pattern.permute.xlu0 %v1349_v3 }
  0xb5   : > { %1230 = vset.pattern.permute.xlu2 %v1355_v20  ;;  %1223 = vset.pattern.permute.xlu1 %v1356_v22 }
  0xb6   : > { %497 = vperm.xlu0 %1227, %v410_v18   ;;  %578 = vperm.xlu2 %1230, %v410_v18  }
  0xb7   : > { %593 = vperm.xlu1 %1223, %v401_v14  }
  0xbe   : > { %1231 = vset.pattern.permute.xlu0 %v1356_v22  ;;  %1233 = vset.pattern.permute.xlu2 %v1350_v4 }
  0xbf   : > { %1226 = vset.pattern.permute.xlu1 %v1350_v4  ;;  %605 = vperm.xlu0 %1231, %v410_v18  }
  0xc0   : > { %443 = vperm.xlu1 %1226, %v410_v18   ;;  %433 = vperm.xlu2 %1233, %v404_v23  }
  0xc7   : > { %1241 = vset.pattern.permute.xlu0 %v1350_v4 }
  0xc8   : > { %1228 = vset.pattern.permute.xlu1 %v1352_v16  ;;  %1234 = vset.pattern.permute.xlu2 %v1353_v17 }
  0xc9   : > { %438 = vperm.xlu0 %1241, %v407_v24   ;;  %524 = vperm.xlu1 %1228, %v410_v18  }
  0xca   : > { %462 = vperm.xlu2 %1234, %v404_v23  }
  0xd1   : > { %1243 = vset.pattern.permute.xlu0 %v1349_v3  ;;  %1229 = vset.pattern.permute.xlu1 %v1348_v2 }
  0xd2   : > { %1235 = vset.pattern.permute.xlu2 %v1349_v3  ;;  %493 = vperm.xlu0 %1243, %v407_v24  }
  0xd3   : > { %551 = vperm.xlu1 %1229, %v410_v18   ;;  %489 = vperm.xlu2 %1235, %v404_v23  }
  0xda   : > { %1244 = vset.pattern.permute.xlu0 %v1354_v19 }
  0xdb   : > { %1232 = vset.pattern.permute.xlu1 %v1351_v15  ;;  %1236 = vset.pattern.permute.xlu2 %v1352_v16 }
  0xdc   : > { %651 = vperm.xlu0 %1244, %v404_v23   ;;  %632 = vperm.xlu1 %1232, %v410_v18  }
  0xdd   : > { %516 = vperm.xlu2 %1236, %v404_v23  }
  0xe4   : > { %1238 = vset.pattern.permute.xlu1 %v1355_v20 }
  0xe5   : > { %1237 = vset.pattern.permute.xlu2 %v1348_v2  ;;  %570 = vperm.xlu1 %1238, %v404_v23  }
  0xe6   : > { %543 = vperm.xlu2 %1237, %v404_v23  }
  0xed   : > { %1242 = vset.pattern.permute.xlu1 %v1353_v17 }
  0xee   : > { %1239 = vset.pattern.permute.xlu2 %v1356_v22  ;;  %466 = vperm.xlu1 %1242, %v407_v24  }
  0xef   : > { %597 = vperm.xlu2 %1239, %v404_v23  }
  0xf4   : > { %v540_v27 = vpop.permute.xlu2 %539 }
  0xf5   : > { %v554_v51 = vsel %vm535_vm7, %v540_v27, 0.0 }
  0xf6   : > { %1245 = vset.pattern.permute.xlu1 %v1354_v19 }
  0xf7   : > { %1240 = vset.pattern.permute.xlu2 %v1351_v15  ;;  %659 = vperm.xlu1 %1245, %v410_v18  }
  0xf8   : > { %624 = vperm.xlu2 %1240, %v404_v23  }
  0xfd   : > { %v621_v31 = vpop.permute.xlu2 %620 }
  0xfe   : > { %v635_v60 = vsel %vm616_vm10, %v621_v31, 0.0 }
  0xff   : > { %1246 = vset.pattern.permute.xlu1 %v1352_v16 }
 0x100   : > { %1248 = vset.pattern.permute.xlu2 %v1355_v20  ;;  %520 = vperm.xlu1 %1246, %v407_v24  }
 0x101   : > { %574 = vperm.xlu2 %1248, %v407_v24  }
 0x107   : > { %v648_v34 = vpop.permute.xlu2 %647 }
 0x108   : > { %1247 = vset.pattern.permute.xlu1 %v1348_v2  ;;  %v662_v62 = vsel %vm643_vm11, %v648_v34, 0.0 }
 0x109   : > { %1249 = vset.pattern.permute.xlu2 %v1356_v22  ;;  %547 = vperm.xlu1 %1247, %v407_v24  }
 0x10a   : > { %601 = vperm.xlu2 %1249, %v407_v24  }
 0x10c   : > { %v486_v35 = vpop.permute.xlu1 %485 }
 0x10d   : > { %v429_v36 = vpop.permute.xlu0 %428  ;;  %v500_v45 = vsel %vm481_vm5, %v486_v35, 0.0 }
 0x10e   : > { %v446_v43 = vsel %vm423_vm4, %v429_v36, 0.0 }
 0x110   : > { %v1517_v39 = vpop.permute.xlu2 %578 }
 0x111   : > { %1250 = vset.pattern.permute.xlu1 %v1351_v15 }
 0x112   : > { %1251 = vset.pattern.permute.xlu2 %v1354_v19  ;;  %628 = vperm.xlu1 %1250, %v407_v24  }
 0x113   : > { %655 = vperm.xlu2 %1251, %v407_v24  }
 0x116   : > { %v513_v40 = vpop.permute.xlu1 %512  ;;  %v459_v41 = vpop.permute.xlu0 %458 }
 0x117   : > { %v473_v42 = vsel %vm454_vm3, %v459_v41, 0.0  ;;  %v527_v49 = vsel %vm508_vm6, %v513_v40, 0.0 }
 0x118   : > { %v477_v44 = vadd.f32 %v473_v42, %v446_v43 }
 0x11a   : > { %v504_v46 = vadd.f32 %v500_v45, %v477_v44  ;;  %v434_v47 = vpop.permute.xlu2 %433  ;;  %v713_v44 = vpop.f32.mrf.mxu2 }
 0x11b   : > { %v447_v12 = vsel %vm423_vm4, %v434_v47, 0.0 }
 0x11c   : > { %v531_v50 = vadd.f32 %v527_v49, %v504_v46 }
 0x11e   : > { %v558_v52 = vadd.f32 %v554_v51, %v531_v50  ;;  %v471_v58 = vpop.permute.xlu0 %470  ;;  %v584_v51 = vsel %vm562_vm8, %v1517_v39, 0.0 }
 0x11f   : > { %v567_v48 = vpop.permute.xlu1 %566  ;;  %v476_v21 = vsel %vm454_vm3, %v471_v58, 0.0 }
 0x120   : > { %v581_v53 = vsel %vm562_vm8, %v567_v48, 0.0 }
 0x121   : > { %v585_v55 = vadd.f32 %v581_v53, %v558_v52 }
 0x124   : > { %v463_v54 = vpop.permute.xlu2 %462 }
 0x125   : > { %v474_v13 = vsel %vm454_vm3, %v463_v54, 0.0 }
 0x126   : > { %v478_v14 = vadd.f32 %v474_v13, %v447_v12 }
 0x128   : > { %v498_v5 = vpop.permute.xlu0 %497 }
 0x129   : > { %v594_v56 = vpop.permute.xlu1 %593  ;;  %v503_v31 = vsel %vm481_vm5, %v498_v5, 0.0 }
 0x12a   : > { %v608_v57 = vsel %vm589_vm9, %v594_v56, 0.0 }
 0x12b   : > { %v612_v59 = vadd.f32 %v608_v57, %v585_v55 }
 0x12d   : > { %v639_v61 = vadd.f32 %v635_v60, %v612_v59  ;;  %v490_v1 = vpop.permute.xlu2 %489 }
 0x12e   : > { %v501_v15 = vsel %vm481_vm5, %v490_v1, 0.0 }
 0x12f   : > { %v666_v0 = vadd.f32 %v662_v62, %v639_v61  ;;  %v505_v18 = vadd.f32 %v501_v15, %v478_v14  ;;  %v759_v62 = vpop.f32.mrf.mxu1 }
 0x131   : > { %v1546_v2 = vadd.f32 %v690_v63, %v666_v0  ;;  %v606_v8 = vpop.permute.xlu0 %605 }
 0x132   : > { %v444_v3 = vpop.permute.xlu1 %443  ;;  %v611_v57 = vsel %vm589_vm9, %v606_v8, 0.0 }
 0x133   : > { %v762_v4 = vsel %vm365_vm0, %v1546_v2, -inf  ;;  %v449_v22 = vsel %vm423_vm4, %v444_v3, 0.0 }
 0x134   : > { %763 = vmax.xlane.f32.xlu0 %v762_v4  ;;  %v480_v25 = vadd.f32 %v476_v21, %v449_v22 }
 0x136   : > { %v507_v34 = vadd.f32 %v503_v31, %v480_v25 }
 0x137   : > { %v517_v6 = vpop.permute.xlu2 %516 }
 0x138   : > { %v528_v20 = vsel %vm508_vm6, %v517_v6, 0.0 }
 0x139   : > { %v532_v24 = vadd.f32 %v528_v20, %v505_v18  ;;  %v736_v20 = vpop.f32.mrf.mxu3 }
 0x13b   : > { %v525_v7 = vpop.permute.xlu1 %524  ;;  %v439_v11 = vpop.permute.xlu0 %438 }
 0x13c   : > { %v530_v32 = vsel %vm508_vm6, %v525_v7, 0.0  ;;  %v448_v45 = vsel %vm423_vm4, %v439_v11, 0.0 }
 0x13d   : > { %v534_v41 = vadd.f32 %v530_v32, %v507_v34 }
 0x140   : > { %v544_v9 = vpop.permute.xlu2 %543 }
 0x141   : > { %v555_v23 = vsel %vm535_vm7, %v544_v9, 0.0 }
 0x142   : > { %v559_v26 = vadd.f32 %v555_v23, %v532_v24 }
 0x144   : > { %v494_v19 = vpop.permute.xlu0 %493 }
 0x145   : > { %v552_v10 = vpop.permute.xlu1 %551  ;;  %v502_v54 = vsel %vm481_vm5, %v494_v19, 0.0 }
 0x146   : > { %v557_v37 = vsel %vm535_vm7, %v552_v10, 0.0 }
 0x147   : > { %v561_v46 = vadd.f32 %v557_v37, %v534_v41 }
 0x149   : > { %v598_v17 = vpop.permute.xlu2 %597  ;;  %v588_v53 = vadd.f32 %v584_v51, %v561_v46  ;;  %v360_v51 = vld [vmem:[%s1617_s29 + $0x8] sm:$0xff] }
 0x14a   : > { %v609_v33 = vsel %vm589_vm9, %v598_v17, 0.0  ;;  %859 = vmatpush.msra.mxu3 %v360_v51 }
 0x14b   : > { %v615_v59 = vadd.f32 %v611_v57, %v588_v53 }
 0x14e   : > { %v633_v16 = vpop.permute.xlu1 %632  ;;  %v652_v35 = vpop.permute.xlu0 %651 }
 0x14f   : > { %v663_v43 = vsel %vm643_vm11, %v652_v35, 0.0  ;;  %v638_v58 = vsel %vm616_vm10, %v633_v16, 0.0 }
 0x150   : > { %v642_v60 = vadd.f32 %v638_v58, %v615_v59 }
 0x152   : > { %v625_v29 = vpop.permute.xlu2 %624 }
 0x153   : > { %v636_v40 = vsel %vm616_vm10, %v625_v29, 0.0 }
 0x157   : > { %v571_v27 = vpop.permute.xlu1 %570 }
 0x158   : > { %v582_v28 = vsel %vm562_vm8, %v571_v27, 0.0 }
 0x159   : > { %v586_v30 = vadd.f32 %v582_v28, %v559_v26 }
 0x15b   : > { %v613_v36 = vadd.f32 %v609_v33, %v586_v30  ;;  %v575_v3 = vpop.permute.xlu2 %574 }
 0x15c   : > { %v583_v11 = vsel %vm562_vm8, %v575_v3, 0.0 }
 0x15d   : > { %v640_v42 = vadd.f32 %v636_v40, %v613_v36 }
 0x15f   : > { %v667_v47 = vadd.f32 %v663_v43, %v640_v42 }
 0x160   : > { %v467_v48 = vpop.permute.xlu1 %466 }
 0x161   : > { %v714_v49 = vadd.f32 %v713_v44, %v667_v47  ;;  %v475_v50 = vsel %vm454_vm3, %v467_v48, 0.0  ;;  %v359_v44 = vld [vmem:[%s1617_s29] sm:$0xff] }
 0x162   : > { %v479_v52 = vadd.f32 %v475_v50, %v448_v45  ;;  %836 = vmatpush.msrb.mxu2 %v359_v44 }
 0x163   : > { %v765_v55 = vsel %vm365_vm0, %v714_v49, -inf }
 0x164   : > { %766 = vmax.xlane.f32.xlu1 %v765_v55  ;;  %v506_v56 = vadd.f32 %v502_v54, %v479_v52  ;;  %v602_v6 = vpop.permute.xlu2 %601  ;;  %v362_v52 = vld [vmem:[%s1617_s29 + $0x18] sm:$0xff] }
 0x165   : > { %v610_v13 = vsel %vm589_vm9, %v602_v6, 0.0  ;;  %905 = vmatpush.msra.mxu2 %v362_v52 }
 0x169   : > { %v660_v61 = vpop.permute.xlu1 %659 }
 0x16a   : > { %v665_v39 = vsel %vm643_vm11, %v660_v61, 0.0 }
 0x16b   : > { %v669_v63 = vadd.f32 %v665_v39, %v642_v60 }
 0x16d   : > { %v760_v0 = vadd.f32 %v759_v62, %v669_v63  ;;  %v656_v15 = vpop.permute.xlu2 %655  ;;  %v1357_v62 = vmov 0.0  }
 0x16e   : > { %v664_v19 = vsel %vm643_vm11, %v656_v15, 0.0  ;;  %918 = vst.msk [vmem:[%s1627_s9] sm:$0xff] %vm365_vm0, %v1357_v62 }
 0x16f   : > { %v771_v1 = vsel %vm365_vm0, %v760_v0, -inf }
 0x170   : > { %772 = vmax.xlane.f32.xlu2 %v771_v1 }
 0x172   : > { %v521_v4 = vpop.permute.xlu1 %520 }
 0x173   : > { %v529_v5 = vsel %vm508_vm6, %v521_v4, 0.0 }
 0x174   : > { %v533_v7 = vadd.f32 %v529_v5, %v506_v56 }
 0x175   : > { %v919_v15 = vld [vmem:[%s1627_s9] sm:$0xff] }
 0x17b   : > { %v548_v8 = vpop.permute.xlu1 %547 }
 0x17c   : > { %v556_v9 = vsel %vm535_vm7, %v548_v8, 0.0 }
 0x17d   : > { %v560_v10 = vadd.f32 %v556_v9, %v533_v7 }
 0x17f   : > { %v587_v12 = vadd.f32 %v583_v11, %v560_v10 }
 0x181   : > { %v614_v14 = vadd.f32 %v610_v13, %v587_v12 }
 0x184   : > { %v629_v16 = vpop.permute.xlu1 %628 }
 0x185   : > { %v637_v17 = vsel %vm616_vm10, %v629_v16, 0.0 }
 0x186   : > { %v641_v18 = vadd.f32 %v637_v17, %v614_v14 }
 0x188   : > { %v668_v21 = vadd.f32 %v664_v19, %v641_v18 }
 0x18a   : > { %v737_v22 = vadd.f32 %v736_v20, %v668_v21 }
 0x18c   : > { %v768_v23 = vsel %vm365_vm0, %v737_v22, -inf }
 0x18d   : > { %769 = vmax.xlane.f32.xlu2 %v768_v23 }
 0x1a7   : > { %v764_v24 = vpop.xlane.xlu0 %763 }
 0x1a8   : > { %v774_v25 = vsub.f32 %v1546_v2, %v764_v24 }
 0x1aa   : > { %v778_v26 = vmul.f32 1.442695, %v774_v25 }
 0x1ac   : > { %1252 = vpow2.f32 %v778_v26 }
 0x1b2   : > { %v1253_v27 = vpop.eup %1252 }
 0x1b3   : > { %v786_v28 = vsel %vm365_vm0, %v1253_v27, 0.0 }
 0x1b4   : > { %787 = vadd.xlane.f32.xlu0 %v786_v28 }
 0x1d7   : > { %v767_v29 = vpop.xlane.xlu1 %766 }
 0x1d8   : > { %v775_v30 = vsub.f32 %v714_v49, %v767_v29 }
 0x1da   : > { %v780_v31 = vmul.f32 1.442695, %v775_v30 }
 0x1dc   : > { %1254 = vpow2.f32 %v780_v31 }
 0x1e2   : > { %v1255_v38 = vpop.eup %1254 }
 0x1e3   : > { %v773_v32 = vpop.xlane.xlu2 %772  ;;  %v789_v33 = vsel %vm365_vm0, %v1255_v38, 0.0 }
 0x1e4   : > { %v777_v34 = vsub.f32 %v760_v0, %v773_v32  ;;  %790 = vadd.xlane.f32.xlu1 %v789_v33  ;;  %v361_v0 = vld [vmem:[%s1617_s29 + $0x10] sm:$0xff]  ;;  %s1288_s29 = scalar_lea.hbm %s1696_s5, 16 }
 0x1e5   : > { %882 = vmatpush.msra.mxu1 %v361_v0  ;;  %p1290_p2 = scmp.lt.s32.totalorder %s1288_s29, %s1284_s25 }
 0x1e6   : > { %v784_v35 = vmul.f32 1.442695, %v777_v34 }
 0x1e7   : > { %p1291_p3 = por %p1290_p2, %p1289_p1 }
 0x1e8   : > { %1256 = vpow2.f32 %v784_v35 }
 0x1e9   : > { %p1292_p5 = pnand %p1291_p3, %p1287_p0 }
 0x1ee   : > { %v1257_v2 = vpop.eup %1256 }
 0x1ef   : > { %v795_v36 = vsel %vm365_vm0, %v1257_v2, 0.0 }
 0x1f0   : > { %796 = vadd.xlane.f32.xlu2 %v795_v36 }
 0x200   : > { %v770_v37 = vpop.xlane.xlu2 %769 }
 0x201   : > { %v776_v40 = vsub.f32 %v737_v22, %v770_v37 }
 0x203   : > { %v782_v41 = vmul.f32 1.442695, %v776_v40 }
 0x205   : > { %1258 = vpow2.f32 %v782_v41 }
 0x20b   : > { %v1259_v42 = vpop.eup %1258 }
 0x20c   : > { %v792_v43 = vsel %vm365_vm0, %v1259_v42, 0.0 }
 0x20d   : > { %793 = vadd.xlane.f32.xlu0 %v792_v43 }
 0x227   : > { %v788_v45 = vpop.xlane.xlu0 %787 }
 0x228   : > { %1260 = vrcp.f32 %v788_v45 }
 0x22e   : > { %v1261_v46 = vpop.eup %1260 }
 0x22f   : > { %v802_v47 = vmul.f32 %v1261_v46, %v788_v45 }
 0x231   : > { %v806_v48 = vsub.f32 2.0, %v802_v47 }
 0x233   : > { %v810_v49 = vmul.f32 %v1261_v46, %v806_v48 }
 0x235   : > { %v814_v50 = vmul.f32 %v1253_v27, %v810_v49 }
 0x237   : > { %1138 = vmatmul.msk.f32.vlgmr.msrb.gmra.mxu2 %vm365_vm0, %v814_v50  ;;  %v920_v9 = vsel %vm365_vm0, %v814_v50, 0.0 }
 0x257   : > { %v791_v53 = vpop.xlane.xlu1 %790 }
 0x258   : > { %1262 = vrcp.f32 %v791_v53 }
 0x25e   : > { %v1263_v54 = vpop.eup %1262 }
 0x25f   : > { %v803_v55 = vmul.f32 %v1263_v54, %v791_v53 }
 0x261   : > { %v807_v56 = vsub.f32 2.0, %v803_v55 }
 0x263   : > { %v811_v57 = vmul.f32 %v1263_v54, %v807_v56  ;;  %v797_v58 = vpop.xlane.xlu2 %796 }
 0x264   : > { %1264 = vrcp.f32 %v797_v58 }
 0x265   : > { %v815_v59 = vmul.f32 %v1255_v38, %v811_v57 }
 0x267   : > { %1139 = vmatmul.msk.f32.vlgmr.msra.gmra.mxu3 %vm365_vm0, %v815_v59  ;;  %v921_v7 = vsel %vm365_vm0, %v815_v59, 0.0 }
 0x268   : > { %v922_v11 = vadd.f32 %v921_v7, %v920_v9 }
 0x26a   : > { %v1265_v60 = vpop.eup %1264 }
 0x26b   : > { %v805_v61 = vmul.f32 %v1265_v60, %v797_v58 }
 0x26d   : > { %v809_v39 = vsub.f32 2.0, %v805_v61 }
 0x26f   : > { %v813_v63 = vmul.f32 %v1265_v60, %v809_v39 }
 0x271   : > { %v817_v1 = vmul.f32 %v1257_v2, %v813_v63 }
 0x273   : > { %1141 = vmatmul.msk.f32.vlgmr.msra.gmra.mxu2 %vm365_vm0, %v817_v1  ;;  %v925_v14 = vsel %vm365_vm0, %v817_v1, 0.0 }
 0x280   : > { %v794_v3 = vpop.xlane.xlu0 %793 }
 0x281   : > { %1266 = vrcp.f32 %v794_v3 }
 0x287   : > { %v1267_v4 = vpop.eup %1266 }
 0x288   : > { %v804_v5 = vmul.f32 %v1267_v4, %v794_v3 }
 0x28a   : > { %v808_v6 = vsub.f32 2.0, %v804_v5 }
 0x28c   : > { %v812_v8 = vmul.f32 %v1267_v4, %v808_v6 }
 0x28e   : > { %v816_v10 = vmul.f32 %v1259_v42, %v812_v8 }
 0x290   : > { %v923_v12 = vsel %vm365_vm0, %v816_v10, 0.0  ;;  %1140 = vmatmul.msk.f32.vlgmr.msra.gmra.mxu1 %vm365_vm0, %v816_v10 }
 0x291   : > { %v924_v13 = vadd.f32 %v923_v12, %v922_v11 }
 0x293   : > { %v926_v16 = vadd.f32 %v925_v14, %v924_v13 }
 0x295   : > { %v927_v17 = vadd.f32 %v926_v16, %v919_v15 }
 0x297   : > { %928 = vst.msk [vmem:[%s1627_s9] sm:$0xff] %vm365_vm0, %v927_v17 }
 0x29e   : > { %v932_v18 = vld [vmem:[%s1627_s9] sm:$0xff] }
 0x29f   : > { %v933_v19 = vmul.f32 0.25, %v932_v18 }
 0x2a1   : > { %934 = vst.msk [vmem:[%s1627_s9] sm:$0xff] %vm365_vm0, %v933_v19 }
 0x2a2   : > { %1295 = shalt.err (!%p1292_p5)
}
 0x2a3   : > { %1152 = dma.vmem_to_hbm [thread:$0]  (%p1428_p4), %s962_s15, 128, %s964_s16, %s945_s17  }
 0x2a4   : > { %s345_s11 = scalar_lea.vmem %s1695_s4, %s1455_s12 }
 0x2ba   : > { %v838_v20 = vpop.f32.mrf.mxu2 }
 0x2bb   : > { %910 = vst.msk [vmem:[%s345_s11] sm:$0xff] %vm365_vm0, %v838_v20 }
 0x2ea   : > { %v861_v21 = vpop.f32.mrf.mxu3 }
 0x2eb   : > { %911 = vst.msk [vmem:[%s345_s11 + $0x8] sm:$0xff] %vm365_vm0, %v861_v21 }
 0x2f6   : > { %v907_v22 = vpop.f32.mrf.mxu2 }
 0x2f7   : > { %913 = vst.msk [vmem:[%s345_s11 + $0x18] sm:$0xff] %vm365_vm0, %v907_v22 }
 0x30d   : > { %v884_v23 = vpop.f32.mrf.mxu1 }
 0x30e   : > { %912 = vst.msk [vmem:[%s345_s11 + $0x10] sm:$0xff] %vm365_vm0, %v884_v23 }
 0x30f PF: > { %p1158_p4 = scmp.ge.s32.totalorder %s1346_s23, 2  ;;  %s987_s28 = sand.u32 1, %s1326_s18  }
 0x310   : > { %s988_s12 = scalar_lea.sflag [#allocation3], %s987_s28 }
 0x311   : > { %p1155_p6 = pnand %p1158_p4, %p1435_p8 }
 0x313   : > { %p1156_p7 = pneg %p1155_p6 }
 0x315   : > { %1321 = dma.done.wait (%p1156_p7), %s988_s12, 128  }
 0x316   : > { %1323 = vsyncadd (%p1156_p7), %s988_s12, 4294967168  ;;  %s19_s23 = sadd.s32 1, %s1346_s23   ;;  %s1699_s18 = smov %s1330_s19 }
 0x317   : > { %p16_p9 = scmp.ge.s32.totalorder %s19_s23, 4   ;;  %s1700_s19 = smov %s1334_s20 }
 0x318   : > { %s1701_s20 = smov %s1441_s6  ;;  %s1702_s21 = smov %s1342_s22 }
 0x319   : > { %s1703_s22 = smov %s1705_s26  ;;  %18 = sbr.rel (!%p16_p9) target bundleno = 4 (0x4), region = 97 }
 0x31e   :  { %994 = vsyncpa [#allocation3], 1 }
 0x31f   :  { %996 = vsyncpa [#allocation3 + $0x1], 1 }

</bundles_post_ra>
